<compile_context>
chip_gen: v6e
topology: v6e:2x2x1
jax: 0.10.0
libtpu: 0.0.40
codegen_flags: <defaults>
</compile_context>

<pallas_src>
import math

import jax
import jax.numpy as jnp
from jax.experimental import pallas as pl
from jax.experimental.pallas import tpu as pltpu

# ---- model config (from the PyTorch module) ----
D_MODEL = 16          # input_size (= d_model of the encoder)
NUM_HEADS = 2
HEAD_DIM = D_MODEL // NUM_HEADS
FF_DIM = 16           # hidden_dim (dim_feedforward)
NUM_LAYERS = 2
FC1_DIM = 64
NUM_CLASSES = 2
LN_EPS = 1e-5

MAX_B_TILE = 256      # batch elements per grid step (VMEM-safe on all gens)


def _layer_norm(x, w, b):
    mean = jnp.mean(x, axis=-1, keepdims=True)
    var = jnp.mean(jnp.square(x - mean), axis=-1, keepdims=True)
    return (x - mean) * jax.lax.rsqrt(var + LN_EPS) * w + b


def transformer_kernel(x_ref, wqkv_ref, wrest_ref, vecs_ref, head_ref, o_ref):
    B, S, E = x_ref.shape
    M = B * S
    FF = FF_DIM

    x = x_ref[...].reshape(M, E)                 # fold batch into matmul M dim

    for l in range(NUM_LAYERS):                  # statically unrolled (2 layers)
        wq = wqkv_ref[l]                         # (E, 3E)   pre-transposed, q pre-scaled
        wr = wrest_ref[l]                        # (2E+FF, E) [out.T ; l1.T ; l2.T]
        vc = vecs_ref[l]                         # (8, 3E)   biases + LN params

        # ---- fused QKV projection ----
        qkv = jnp.dot(x, wq, preferred_element_type=jnp.float32) + vc[0:1, :]  # (M, 3E)
        q = qkv[:, 0:E].reshape(B, S, E)         # already scaled by 1/sqrt(head_dim)
        k = qkv[:, E:2 * E].reshape(B, S, E)
        v = qkv[:, 2 * E:3 * E].reshape(B, S, E)

        # ---- multi-head self-attention (batched over B per head) ----
        head_ctx = []
        for h in range(NUM_HEADS):
            sl = slice(h * HEAD_DIM, (h + 1) * HEAD_DIM)
            qh, kh, vh = q[..., sl], k[..., sl], v[..., sl]
            s_h = jnp.einsum('bqd,bkd->bqk', qh, kh,
                             preferred_element_type=jnp.float32)          # (B,S,S)
            m_h = jnp.max(s_h, axis=-1, keepdims=True)
            p_h = jnp.exp(s_h - m_h)
            inv = pl.reciprocal(jnp.sum(p_h, axis=-1, keepdims=True), approx=True)
            a_h = p_h * inv
            head_ctx.append(jnp.einsum('bqk,bkd->bqd', a_h, vh,
                                       preferred_element_type=jnp.float32))
        ctx = jnp.concatenate(head_ctx, axis=-1).reshape(M, E)

        # ---- attention out-projection + residual + LayerNorm1 ----
        attn_out = (jnp.dot(ctx, wr[0:E, :], preferred_element_type=jnp.float32)
                    + vc[1:2, 0:E])
        x = _layer_norm(x + attn_out, vc[2:3, 0:E], vc[2:3, E:2 * E])

        # ---- feed-forward (ReLU) + residual + LayerNorm2 ----
        ff = (jnp.dot(x, wr[E:2 * E, :], preferred_element_type=jnp.float32)
              + vc[1:2, E:E + FF])
        ff = jnp.maximum(ff, 0.0)
        ff = (jnp.dot(ff, wr[2 * E:2 * E + FF, :], preferred_element_type=jnp.float32)
              + vc[1:2, E + FF:E + FF + E])
        x = _layer_norm(x + ff, vc[3:4, 0:E], vc[3:4, E:2 * E])

    # ---- classifier head: fc1 -> fc2 -> softmax (exact, f32) ----
    hd = head_ref[...]                                      # (88, 64) packed
    fc1_wt = hd[0:D_MODEL, :]                               # (16, 64)
    fc2_wt = hd[D_MODEL:D_MODEL + FC1_DIM, :]               # (64, 64) (cols>=2 are zero-pad)
    fc1_b = hd[D_MODEL + FC1_DIM:D_MODEL + FC1_DIM + 1, :]  # (1, 64)
    fc2_b = hd[D_MODEL + FC1_DIM + 1:D_MODEL + FC1_DIM + 2, :]

    h1 = jnp.dot(x, fc1_wt, preferred_element_type=jnp.float32) + fc1_b     # (M, 64)
    h2 = jnp.dot(h1, fc2_wt, preferred_element_type=jnp.float32) + fc2_b    # (M, 64)
    logits = h2[:, 0:NUM_CLASSES]                                           # (M, 2)
    m = jnp.max(logits, axis=-1, keepdims=True)
    e = jnp.exp(logits - m)
    probs = e / jnp.sum(e, axis=-1, keepdims=True)

    o_ref[...] = probs.reshape(B, S, NUM_CLASSES)


def init_params(key):
    """Deterministic synthetic parameters matching the PyTorch module shapes."""
    ks = jax.random.split(key, 16)
    s = 0.1

    def nrm(k, shape):
        return (s * jax.random.normal(k, shape)).astype(jnp.float32)

    return dict(
        in_w=nrm(ks[0], (NUM_LAYERS, 3 * D_MODEL, D_MODEL)),
        in_b=nrm(ks[1], (NUM_LAYERS, 1, 3 * D_MODEL)),
        out_w=nrm(ks[2], (NUM_LAYERS, D_MODEL, D_MODEL)),
        out_b=nrm(ks[3], (NUM_LAYERS, 1, D_MODEL)),
        l1_w=nrm(ks[4], (NUM_LAYERS, FF_DIM, D_MODEL)),
        l1_b=nrm(ks[5], (NUM_LAYERS, 1, FF_DIM)),
        l2_w=nrm(ks[6], (NUM_LAYERS, D_MODEL, FF_DIM)),
        l2_b=nrm(ks[7], (NUM_LAYERS, 1, D_MODEL)),
        ln1_w=jnp.ones((NUM_LAYERS, 1, D_MODEL), jnp.float32),
        ln1_b=jnp.zeros((NUM_LAYERS, 1, D_MODEL), jnp.float32),
        ln2_w=jnp.ones((NUM_LAYERS, 1, D_MODEL), jnp.float32),
        ln2_b=jnp.zeros((NUM_LAYERS, 1, D_MODEL), jnp.float32),
        fc1_w=nrm(ks[8], (FC1_DIM, D_MODEL)),
        fc1_b=nrm(ks[9], (1, FC1_DIM)),
        fc2_w=nrm(ks[10], (NUM_CLASSES, FC1_DIM)),
        fc2_b=nrm(ks[11], (1, NUM_CLASSES)),
    )


def pack_params(params):
    """Pre-transpose and pack the 16 PyTorch-shaped params into 4 f32 slabs."""
    L, E, FF = NUM_LAYERS, D_MODEL, FF_DIM
    scale = 1.0 / math.sqrt(HEAD_DIM)

    # QKV in-proj, transposed to (L, E, 3E); fold the q scale into weights/bias.
    q_scale = jnp.concatenate([jnp.full((E,), scale, jnp.float32),
                               jnp.ones((2 * E,), jnp.float32)])
    wqkv = jnp.transpose(params['in_w'], (0, 2, 1)) * q_scale[None, None, :]
    b_in = params['in_b'][:, 0, :] * q_scale[None, :]                     # (L, 3E)

    # Per-layer [out_proj.T ; linear1.T ; linear2.T] stacked along rows.
    wrest = jnp.concatenate([
        jnp.transpose(params['out_w'], (0, 2, 1)),   # (L, E, E)
        jnp.transpose(params['l1_w'], (0, 2, 1)),    # (L, E, FF)
        jnp.transpose(params['l2_w'], (0, 2, 1)),    # (L, FF, E)
    ], axis=1)                                       # (L, 2E+FF, E)

    zeros16 = jnp.zeros((L, E), jnp.float32)
    row0 = b_in
    row1 = jnp.concatenate([params['out_b'][:, 0, :],
                            params['l1_b'][:, 0, :],
                            params['l2_b'][:, 0, :]], axis=-1)            # (L, 3E)
    row2 = jnp.concatenate([params['ln1_w'][:, 0, :],
                            params['ln1_b'][:, 0, :], zeros16], axis=-1)
    row3 = jnp.concatenate([params['ln2_w'][:, 0, :],
                            params['ln2_b'][:, 0, :], zeros16], axis=-1)
    zrow = jnp.zeros_like(row0)
    vecs = jnp.stack([row0, row1, row2, row3, zrow, zrow, zrow, zrow], axis=1)  # (L, 8, 3E)

    fc1_wt = params['fc1_w'].T                                            # (16, 64)
    fc2_wt = jnp.pad(params['fc2_w'].T, ((0, 0), (0, FC1_DIM - NUM_CLASSES)))   # (64, 64)
    fc1_b = params['fc1_b']                                               # (1, 64)
    fc2_b = jnp.pad(params['fc2_b'], ((0, 0), (0, FC1_DIM - NUM_CLASSES)))      # (1, 64)
    head = jnp.concatenate([fc1_wt, fc2_wt, fc1_b, fc2_b,
                            jnp.zeros((6, FC1_DIM), jnp.float32)], axis=0)      # (88, 64)

    return wqkv, wrest, vecs, head


def transformer_forward(x_nes, packed, *, b_tile=None):
    """x_nes: (batch, input_size, seq) exactly as the PyTorch module consumes."""
    wqkv, wrest, vecs, head = packed
    x = jnp.transpose(x_nes, (0, 2, 1)).astype(jnp.float32)   # (N, S, E)
    N, S, E = x.shape
    assert E == D_MODEL

    if b_tile is None:
        b_tile = max(1, min(N, MAX_B_TILE))
    n_pad = ((N + b_tile - 1) // b_tile) * b_tile
    if n_pad != N:
        x = jnp.pad(x, ((0, n_pad - N), (0, 0), (0, 0)))
    grid = (n_pad // b_tile,)

    in_specs = [
        pl.BlockSpec((b_tile, S, E), lambda b: (b, 0, 0)),
        pl.BlockSpec(wqkv.shape, lambda b: (0, 0, 0)),
        pl.BlockSpec(wrest.shape, lambda b: (0, 0, 0)),
        pl.BlockSpec(vecs.shape, lambda b: (0, 0, 0)),
        pl.BlockSpec(head.shape, lambda b: (0, 0)),
    ]
    out_spec = pl.BlockSpec((b_tile, S, NUM_CLASSES), lambda b: (b, 0, 0))

    out = pl.pallas_call(
        transformer_kernel,
        out_shape=jax.ShapeDtypeStruct((n_pad, S, NUM_CLASSES), jnp.float32),
        grid_spec=pltpu.PrefetchScalarGridSpec(
            num_scalar_prefetch=0,
            grid=grid,
            in_specs=in_specs,
            out_specs=out_spec,
        ),
        compiler_params=pltpu.CompilerParams(
            dimension_semantics=("parallel",)),
    )(x, wqkv, wrest, vecs, head)

    return out[:N]


if __name__ == "__main__":
    key = jax.random.PRNGKey(0)
    k_x, k_p = jax.random.split(key)

    batch, seq = 2, 8
    # PyTorch module input layout: (batch, input_size, seq)
    x = jax.random.normal(k_x, (batch, D_MODEL, seq), dtype=jnp.float32)
    params = init_params(k_p)
    packed = pack_params(params)

    out = transformer_forward(x, packed)
    out = jax.block_until_ready(out)

    assert out.shape == (batch, seq, NUM_CLASSES)
    # softmax rows must sum to 1
    assert jnp.allclose(jnp.sum(out, axis=-1), 1.0, atol=1e-5)
    print("KERNEL_OK")
</pallas_src>

<mosaic_0001>
module attributes {stable_mosaic.version = 11 : i64} {
  func.func @transformer_kernel(%arg0: i32, %arg1: memref<2x8x16xf32, #tpu.memory_space<vmem>>, %arg2: memref<2x16x48xf32, #tpu.memory_space<vmem>>, %arg3: memref<2x48x16xf32, #tpu.memory_space<vmem>>, %arg4: memref<2x8x48xf32, #tpu.memory_space<vmem>>, %arg5: memref<88x64xf32, #tpu.memory_space<vmem>>, %arg6: memref<2x8x2xf32, #tpu.memory_space<vmem>>) attributes {dimension_semantics = [#tpu.dimension_semantics<parallel>], iteration_bounds = array<i64: 1>, scalar_prefetch = 0 : i64, scratch_operands = 0 : i64, tpu.core_type = #tpu.core_type<tc>, window_params = [{transform_indices = @transform_0, window_bounds = array<i64: 2, 8, 16>}, {pipeline_mode = #tpu.pipeline_mode<synchronous>, transform_indices = @transform_1, window_bounds = array<i64: 2, 16, 48>}, {pipeline_mode = #tpu.pipeline_mode<synchronous>, transform_indices = @transform_2, window_bounds = array<i64: 2, 48, 16>}, {pipeline_mode = #tpu.pipeline_mode<synchronous>, transform_indices = @transform_3, window_bounds = array<i64: 2, 8, 48>}, {pipeline_mode = #tpu.pipeline_mode<synchronous>, transform_indices = @transform_4, window_bounds = array<i64: 88, 64>}, {transform_indices = @transform_5, window_bounds = array<i64: 2, 8, 2>}]} {
    %c0 = arith.constant 0 : index
    %c0_0 = arith.constant 0 : index
    %c0_1 = arith.constant 0 : index
    %0 = vector.load %arg1[%c0, %c0_0, %c0_1] : memref<2x8x16xf32, #tpu.memory_space<vmem>>, vector<2x8x16xf32>
    %1 = vector.shape_cast %0 : vector<2x8x16xf32> to vector<16x16xf32>
    %c0_2 = arith.constant 0 : index
    %c0_3 = arith.constant 0 : index
    %c0_4 = arith.constant 0 : index
    %2 = vector.load %arg2[%c0_2, %c0_3, %c0_4] : memref<2x16x48xf32, #tpu.memory_space<vmem>>, vector<1x16x48xf32>
    %3 = vector.shape_cast %2 : vector<1x16x48xf32> to vector<16x48xf32>
    %c0_5 = arith.constant 0 : index
    %c0_6 = arith.constant 0 : index
    %c0_7 = arith.constant 0 : index
    %4 = vector.load %arg3[%c0_5, %c0_6, %c0_7] : memref<2x48x16xf32, #tpu.memory_space<vmem>>, vector<1x48x16xf32>
    %5 = vector.shape_cast %4 : vector<1x48x16xf32> to vector<48x16xf32>
    %c0_8 = arith.constant 0 : index
    %c0_9 = arith.constant 0 : index
    %c0_10 = arith.constant 0 : index
    %6 = vector.load %arg4[%c0_8, %c0_9, %c0_10] : memref<2x8x48xf32, #tpu.memory_space<vmem>>, vector<1x8x48xf32>
    %7 = vector.shape_cast %6 : vector<1x8x48xf32> to vector<8x48xf32>
    %cst = arith.constant dense<0.000000e+00> : vector<16x48xf32>
    %8 = tpu.matmul %1, %3, %cst {dimension_numbers = #tpu.dot_dimension_numbers<[1], [0], [0], [1], [0, 0, 1, 1], [], []>} : vector<16x16xf32>, vector<16x48xf32>, vector<16x48xf32> -> vector<16x48xf32>
    %9 = vector.extract_strided_slice %7 {offsets = [0, 0], sizes = [1, 48], strides = [1, 1]} : vector<8x48xf32> to vector<1x48xf32>
    %10 = vector.broadcast %9 : vector<1x48xf32> to vector<16x48xf32>
    %11 = arith.addf %8, %10 : vector<16x48xf32>
    %12 = vector.extract_strided_slice %11 {offsets = [0, 0], sizes = [16, 16], strides = [1, 1]} : vector<16x48xf32> to vector<16x16xf32>
    %13 = vector.shape_cast %12 : vector<16x16xf32> to vector<2x8x16xf32>
    %14 = vector.extract_strided_slice %11 {offsets = [0, 16], sizes = [16, 16], strides = [1, 1]} : vector<16x48xf32> to vector<16x16xf32>
    %15 = vector.shape_cast %14 : vector<16x16xf32> to vector<2x8x16xf32>
    %16 = vector.extract_strided_slice %11 {offsets = [0, 32], sizes = [16, 16], strides = [1, 1]} : vector<16x48xf32> to vector<16x16xf32>
    %17 = vector.shape_cast %16 : vector<16x16xf32> to vector<2x8x16xf32>
    %18 = vector.extract_strided_slice %13 {offsets = [0, 0, 0], sizes = [2, 8, 8], strides = [1, 1, 1]} : vector<2x8x16xf32> to vector<2x8x8xf32>
    %19 = vector.extract_strided_slice %15 {offsets = [0, 0, 0], sizes = [2, 8, 8], strides = [1, 1, 1]} : vector<2x8x16xf32> to vector<2x8x8xf32>
    %20 = vector.extract_strided_slice %17 {offsets = [0, 0, 0], sizes = [2, 8, 8], strides = [1, 1, 1]} : vector<2x8x16xf32> to vector<2x8x8xf32>
    "tpu.trace_start"() <{level = 10 : i32, message = "bqd,bkd->bqk"}> : () -> ()
    %cst_11 = arith.constant dense<0.000000e+00> : vector<2x8x8xf32>
    %21 = tpu.matmul %18, %19, %cst_11 {dimension_numbers = #tpu.dot_dimension_numbers<[2], [2], [1], [1], [0, 0, 0, 1, 1, 1], [0], [0]>} : vector<2x8x8xf32>, vector<2x8x8xf32>, vector<2x8x8xf32> -> vector<2x8x8xf32>
    "tpu.trace_stop"() : () -> ()
    %cst_12 = arith.constant dense<0xFF800000> : vector<2x8xf32>
    %22 = vector.multi_reduction <maximumf>, %21, %cst_12 [2] : vector<2x8x8xf32> to vector<2x8xf32>
    %23 = vector.shape_cast %22 : vector<2x8xf32> to vector<2x8x1xf32>
    %24 = vector.broadcast %23 : vector<2x8x1xf32> to vector<2x8x8xf32>
    %25 = arith.subf %21, %24 : vector<2x8x8xf32>
    %26 = math.exp %25 : vector<2x8x8xf32>
    %cst_13 = arith.constant dense<0.000000e+00> : vector<2x8xf32>
    %27 = vector.multi_reduction <add>, %26, %cst_13 [2] : vector<2x8x8xf32> to vector<2x8xf32>
    %28 = vector.shape_cast %27 : vector<2x8xf32> to vector<2x8x1xf32>
    %29 = tpu.reciprocal %28 {approx = true} : vector<2x8x1xf32> -> vector<2x8x1xf32>
    %30 = vector.broadcast %29 : vector<2x8x1xf32> to vector<2x8x8xf32>
    %31 = arith.mulf %26, %30 : vector<2x8x8xf32>
    "tpu.trace_start"() <{level = 10 : i32, message = "bqk,bkd->bqd"}> : () -> ()
    %cst_14 = arith.constant dense<0.000000e+00> : vector<2x8x8xf32>
    %32 = tpu.matmul %31, %20, %cst_14 {dimension_numbers = #tpu.dot_dimension_numbers<[2], [1], [1], [2], [0, 0, 0, 1, 1, 2], [0], [0]>} : vector<2x8x8xf32>, vector<2x8x8xf32>, vector<2x8x8xf32> -> vector<2x8x8xf32>
    "tpu.trace_stop"() : () -> ()
    %33 = vector.extract_strided_slice %13 {offsets = [0, 0, 8], sizes = [2, 8, 8], strides = [1, 1, 1]} : vector<2x8x16xf32> to vector<2x8x8xf32>
    %34 = vector.extract_strided_slice %15 {offsets = [0, 0, 8], sizes = [2, 8, 8], strides = [1, 1, 1]} : vector<2x8x16xf32> to vector<2x8x8xf32>
    %35 = vector.extract_strided_slice %17 {offsets = [0, 0, 8], sizes = [2, 8, 8], strides = [1, 1, 1]} : vector<2x8x16xf32> to vector<2x8x8xf32>
    "tpu.trace_start"() <{level = 10 : i32, message = "bqd,bkd->bqk"}> : () -> ()
    %cst_15 = arith.constant dense<0.000000e+00> : vector<2x8x8xf32>
    %36 = tpu.matmul %33, %34, %cst_15 {dimension_numbers = #tpu.dot_dimension_numbers<[2], [2], [1], [1], [0, 0, 0, 1, 1, 1], [0], [0]>} : vector<2x8x8xf32>, vector<2x8x8xf32>, vector<2x8x8xf32> -> vector<2x8x8xf32>
    "tpu.trace_stop"() : () -> ()
    %cst_16 = arith.constant dense<0xFF800000> : vector<2x8xf32>
    %37 = vector.multi_reduction <maximumf>, %36, %cst_16 [2] : vector<2x8x8xf32> to vector<2x8xf32>
    %38 = vector.shape_cast %37 : vector<2x8xf32> to vector<2x8x1xf32>
    %39 = vector.broadcast %38 : vector<2x8x1xf32> to vector<2x8x8xf32>
    %40 = arith.subf %36, %39 : vector<2x8x8xf32>
    %41 = math.exp %40 : vector<2x8x8xf32>
    %cst_17 = arith.constant dense<0.000000e+00> : vector<2x8xf32>
    %42 = vector.multi_reduction <add>, %41, %cst_17 [2] : vector<2x8x8xf32> to vector<2x8xf32>
    %43 = vector.shape_cast %42 : vector<2x8xf32> to vector<2x8x1xf32>
    %44 = tpu.reciprocal %43 {approx = true} : vector<2x8x1xf32> -> vector<2x8x1xf32>
    %45 = vector.broadcast %44 : vector<2x8x1xf32> to vector<2x8x8xf32>
    %46 = arith.mulf %41, %45 : vector<2x8x8xf32>
    "tpu.trace_start"() <{level = 10 : i32, message = "bqk,bkd->bqd"}> : () -> ()
    %cst_18 = arith.constant dense<0.000000e+00> : vector<2x8x8xf32>
    %47 = tpu.matmul %46, %35, %cst_18 {dimension_numbers = #tpu.dot_dimension_numbers<[2], [1], [1], [2], [0, 0, 0, 1, 1, 2], [0], [0]>} : vector<2x8x8xf32>, vector<2x8x8xf32>, vector<2x8x8xf32> -> vector<2x8x8xf32>
    "tpu.trace_stop"() : () -> ()
    %48 = tpu.concatenate %32, %47 in 2 : vector<2x8x8xf32>, vector<2x8x8xf32> -> vector<2x8x16xf32>
    %49 = vector.shape_cast %48 : vector<2x8x16xf32> to vector<16x16xf32>
    %50 = vector.extract_strided_slice %5 {offsets = [0, 0], sizes = [16, 16], strides = [1, 1]} : vector<48x16xf32> to vector<16x16xf32>
    %cst_19 = arith.constant dense<0.000000e+00> : vector<16x16xf32>
    %51 = tpu.matmul %49, %50, %cst_19 {dimension_numbers = #tpu.dot_dimension_numbers<[1], [0], [0], [1], [0, 0, 1, 1], [], []>} : vector<16x16xf32>, vector<16x16xf32>, vector<16x16xf32> -> vector<16x16xf32>
    %52 = vector.extract_strided_slice %7 {offsets = [1, 0], sizes = [1, 16], strides = [1, 1]} : vector<8x48xf32> to vector<1x16xf32>
    %53 = vector.broadcast %52 : vector<1x16xf32> to vector<16x16xf32>
    %54 = arith.addf %51, %53 : vector<16x16xf32>
    %55 = arith.addf %1, %54 : vector<16x16xf32>
    %56 = vector.extract_strided_slice %7 {offsets = [2, 0], sizes = [1, 16], strides = [1, 1]} : vector<8x48xf32> to vector<1x16xf32>
    %57 = vector.extract_strided_slice %7 {offsets = [2, 16], sizes = [1, 16], strides = [1, 1]} : vector<8x48xf32> to vector<1x16xf32>
    %cst_20 = arith.constant dense<0.000000e+00> : vector<16xf32>
    %58 = vector.multi_reduction <add>, %55, %cst_20 [1] : vector<16x16xf32> to vector<16xf32>
    %59 = vector.shape_cast %58 : vector<16xf32> to vector<16x1xf32>
    %cst_21 = arith.constant 1.600000e+01 : f32
    %60 = vector.broadcast %cst_21 : f32 to vector<16x1xf32>
    %61 = arith.divf %59, %60 : vector<16x1xf32>
    %62 = vector.broadcast %61 : vector<16x1xf32> to vector<16x16xf32>
    %63 = arith.subf %55, %62 : vector<16x16xf32>
    %64 = arith.mulf %63, %63 : vector<16x16xf32>
    %cst_22 = arith.constant dense<0.000000e+00> : vector<16xf32>
    %65 = vector.multi_reduction <add>, %64, %cst_22 [1] : vector<16x16xf32> to vector<16xf32>
    %66 = vector.shape_cast %65 : vector<16xf32> to vector<16x1xf32>
    %cst_23 = arith.constant 1.600000e+01 : f32
    %67 = vector.broadcast %cst_23 : f32 to vector<16x1xf32>
    %68 = arith.divf %66, %67 : vector<16x1xf32>
    %69 = vector.broadcast %61 : vector<16x1xf32> to vector<16x16xf32>
    %70 = arith.subf %55, %69 : vector<16x16xf32>
    %cst_24 = arith.constant 9.99999974E-6 : f32
    %71 = vector.broadcast %cst_24 : f32 to vector<16x1xf32>
    %72 = arith.addf %68, %71 : vector<16x1xf32>
    %73 = math.rsqrt %72 : vector<16x1xf32>
    %74 = vector.broadcast %73 : vector<16x1xf32> to vector<16x16xf32>
    %75 = arith.mulf %70, %74 : vector<16x16xf32>
    %76 = vector.broadcast %56 : vector<1x16xf32> to vector<16x16xf32>
    %77 = arith.mulf %75, %76 : vector<16x16xf32>
    %78 = vector.broadcast %57 : vector<1x16xf32> to vector<16x16xf32>
    %79 = arith.addf %77, %78 : vector<16x16xf32>
    %80 = vector.extract_strided_slice %5 {offsets = [16, 0], sizes = [16, 16], strides = [1, 1]} : vector<48x16xf32> to vector<16x16xf32>
    %cst_25 = arith.constant dense<0.000000e+00> : vector<16x16xf32>
    %81 = tpu.matmul %79, %80, %cst_25 {dimension_numbers = #tpu.dot_dimension_numbers<[1], [0], [0], [1], [0, 0, 1, 1], [], []>} : vector<16x16xf32>, vector<16x16xf32>, vector<16x16xf32> -> vector<16x16xf32>
    %82 = vector.extract_strided_slice %7 {offsets = [1, 16], sizes = [1, 16], strides = [1, 1]} : vector<8x48xf32> to vector<1x16xf32>
    %83 = vector.broadcast %82 : vector<1x16xf32> to vector<16x16xf32>
    %84 = arith.addf %81, %83 : vector<16x16xf32>
    %cst_26 = arith.constant 0.000000e+00 : f32
    %85 = vector.broadcast %cst_26 : f32 to vector<16x16xf32>
    %86 = arith.maximumf %84, %85 : vector<16x16xf32>
    %87 = vector.extract_strided_slice %5 {offsets = [32, 0], sizes = [16, 16], strides = [1, 1]} : vector<48x16xf32> to vector<16x16xf32>
    %cst_27 = arith.constant dense<0.000000e+00> : vector<16x16xf32>
    %88 = tpu.matmul %86, %87, %cst_27 {dimension_numbers = #tpu.dot_dimension_numbers<[1], [0], [0], [1], [0, 0, 1, 1], [], []>} : vector<16x16xf32>, vector<16x16xf32>, vector<16x16xf32> -> vector<16x16xf32>
    %89 = vector.extract_strided_slice %7 {offsets = [1, 32], sizes = [1, 16], strides = [1, 1]} : vector<8x48xf32> to vector<1x16xf32>
    %90 = vector.broadcast %89 : vector<1x16xf32> to vector<16x16xf32>
    %91 = arith.addf %88, %90 : vector<16x16xf32>
    %92 = arith.addf %79, %91 : vector<16x16xf32>
    %93 = vector.extract_strided_slice %7 {offsets = [3, 0], sizes = [1, 16], strides = [1, 1]} : vector<8x48xf32> to vector<1x16xf32>
    %94 = vector.extract_strided_slice %7 {offsets = [3, 16], sizes = [1, 16], strides = [1, 1]} : vector<8x48xf32> to vector<1x16xf32>
    %cst_28 = arith.constant dense<0.000000e+00> : vector<16xf32>
    %95 = vector.multi_reduction <add>, %92, %cst_28 [1] : vector<16x16xf32> to vector<16xf32>
    %96 = vector.shape_cast %95 : vector<16xf32> to vector<16x1xf32>
    %cst_29 = arith.constant 1.600000e+01 : f32
    %97 = vector.broadcast %cst_29 : f32 to vector<16x1xf32>
    %98 = arith.divf %96, %97 : vector<16x1xf32>
    %99 = vector.broadcast %98 : vector<16x1xf32> to vector<16x16xf32>
    %100 = arith.subf %92, %99 : vector<16x16xf32>
    %101 = arith.mulf %100, %100 : vector<16x16xf32>
    %cst_30 = arith.constant dense<0.000000e+00> : vector<16xf32>
    %102 = vector.multi_reduction <add>, %101, %cst_30 [1] : vector<16x16xf32> to vector<16xf32>
    %103 = vector.shape_cast %102 : vector<16xf32> to vector<16x1xf32>
    %cst_31 = arith.constant 1.600000e+01 : f32
    %104 = vector.broadcast %cst_31 : f32 to vector<16x1xf32>
    %105 = arith.divf %103, %104 : vector<16x1xf32>
    %106 = vector.broadcast %98 : vector<16x1xf32> to vector<16x16xf32>
    %107 = arith.subf %92, %106 : vector<16x16xf32>
    %cst_32 = arith.constant 9.99999974E-6 : f32
    %108 = vector.broadcast %cst_32 : f32 to vector<16x1xf32>
    %109 = arith.addf %105, %108 : vector<16x1xf32>
    %110 = math.rsqrt %109 : vector<16x1xf32>
    %111 = vector.broadcast %110 : vector<16x1xf32> to vector<16x16xf32>
    %112 = arith.mulf %107, %111 : vector<16x16xf32>
    %113 = vector.broadcast %93 : vector<1x16xf32> to vector<16x16xf32>
    %114 = arith.mulf %112, %113 : vector<16x16xf32>
    %115 = vector.broadcast %94 : vector<1x16xf32> to vector<16x16xf32>
    %116 = arith.addf %114, %115 : vector<16x16xf32>
    %c1 = arith.constant 1 : index
    %c0_33 = arith.constant 0 : index
    %c0_34 = arith.constant 0 : index
    %117 = vector.load %arg2[%c1, %c0_33, %c0_34] : memref<2x16x48xf32, #tpu.memory_space<vmem>>, vector<1x16x48xf32>
    %118 = vector.shape_cast %117 : vector<1x16x48xf32> to vector<16x48xf32>
    %c1_35 = arith.constant 1 : index
    %c0_36 = arith.constant 0 : index
    %c0_37 = arith.constant 0 : index
    %119 = vector.load %arg3[%c1_35, %c0_36, %c0_37] : memref<2x48x16xf32, #tpu.memory_space<vmem>>, vector<1x48x16xf32>
    %120 = vector.shape_cast %119 : vector<1x48x16xf32> to vector<48x16xf32>
    %c1_38 = arith.constant 1 : index
    %c0_39 = arith.constant 0 : index
    %c0_40 = arith.constant 0 : index
    %121 = vector.load %arg4[%c1_38, %c0_39, %c0_40] : memref<2x8x48xf32, #tpu.memory_space<vmem>>, vector<1x8x48xf32>
    %122 = vector.shape_cast %121 : vector<1x8x48xf32> to vector<8x48xf32>
    %cst_41 = arith.constant dense<0.000000e+00> : vector<16x48xf32>
    %123 = tpu.matmul %116, %118, %cst_41 {dimension_numbers = #tpu.dot_dimension_numbers<[1], [0], [0], [1], [0, 0, 1, 1], [], []>} : vector<16x16xf32>, vector<16x48xf32>, vector<16x48xf32> -> vector<16x48xf32>
    %124 = vector.extract_strided_slice %122 {offsets = [0, 0], sizes = [1, 48], strides = [1, 1]} : vector<8x48xf32> to vector<1x48xf32>
    %125 = vector.broadcast %124 : vector<1x48xf32> to vector<16x48xf32>
    %126 = arith.addf %123, %125 : vector<16x48xf32>
    %127 = vector.extract_strided_slice %126 {offsets = [0, 0], sizes = [16, 16], strides = [1, 1]} : vector<16x48xf32> to vector<16x16xf32>
    %128 = vector.shape_cast %127 : vector<16x16xf32> to vector<2x8x16xf32>
    %129 = vector.extract_strided_slice %126 {offsets = [0, 16], sizes = [16, 16], strides = [1, 1]} : vector<16x48xf32> to vector<16x16xf32>
    %130 = vector.shape_cast %129 : vector<16x16xf32> to vector<2x8x16xf32>
    %131 = vector.extract_strided_slice %126 {offsets = [0, 32], sizes = [16, 16], strides = [1, 1]} : vector<16x48xf32> to vector<16x16xf32>
    %132 = vector.shape_cast %131 : vector<16x16xf32> to vector<2x8x16xf32>
    %133 = vector.extract_strided_slice %128 {offsets = [0, 0, 0], sizes = [2, 8, 8], strides = [1, 1, 1]} : vector<2x8x16xf32> to vector<2x8x8xf32>
    %134 = vector.extract_strided_slice %130 {offsets = [0, 0, 0], sizes = [2, 8, 8], strides = [1, 1, 1]} : vector<2x8x16xf32> to vector<2x8x8xf32>
    %135 = vector.extract_strided_slice %132 {offsets = [0, 0, 0], sizes = [2, 8, 8], strides = [1, 1, 1]} : vector<2x8x16xf32> to vector<2x8x8xf32>
    "tpu.trace_start"() <{level = 10 : i32, message = "bqd,bkd->bqk"}> : () -> ()
    %cst_42 = arith.constant dense<0.000000e+00> : vector<2x8x8xf32>
    %136 = tpu.matmul %133, %134, %cst_42 {dimension_numbers = #tpu.dot_dimension_numbers<[2], [2], [1], [1], [0, 0, 0, 1, 1, 1], [0], [0]>} : vector<2x8x8xf32>, vector<2x8x8xf32>, vector<2x8x8xf32> -> vector<2x8x8xf32>
    "tpu.trace_stop"() : () -> ()
    %cst_43 = arith.constant dense<0xFF800000> : vector<2x8xf32>
    %137 = vector.multi_reduction <maximumf>, %136, %cst_43 [2] : vector<2x8x8xf32> to vector<2x8xf32>
    %138 = vector.shape_cast %137 : vector<2x8xf32> to vector<2x8x1xf32>
    %139 = vector.broadcast %138 : vector<2x8x1xf32> to vector<2x8x8xf32>
    %140 = arith.subf %136, %139 : vector<2x8x8xf32>
    %141 = math.exp %140 : vector<2x8x8xf32>
    %cst_44 = arith.constant dense<0.000000e+00> : vector<2x8xf32>
    %142 = vector.multi_reduction <add>, %141, %cst_44 [2] : vector<2x8x8xf32> to vector<2x8xf32>
    %143 = vector.shape_cast %142 : vector<2x8xf32> to vector<2x8x1xf32>
    %144 = tpu.reciprocal %143 {approx = true} : vector<2x8x1xf32> -> vector<2x8x1xf32>
    %145 = vector.broadcast %144 : vector<2x8x1xf32> to vector<2x8x8xf32>
    %146 = arith.mulf %141, %145 : vector<2x8x8xf32>
    "tpu.trace_start"() <{level = 10 : i32, message = "bqk,bkd->bqd"}> : () -> ()
    %cst_45 = arith.constant dense<0.000000e+00> : vector<2x8x8xf32>
    %147 = tpu.matmul %146, %135, %cst_45 {dimension_numbers = #tpu.dot_dimension_numbers<[2], [1], [1], [2], [0, 0, 0, 1, 1, 2], [0], [0]>} : vector<2x8x8xf32>, vector<2x8x8xf32>, vector<2x8x8xf32> -> vector<2x8x8xf32>
    "tpu.trace_stop"() : () -> ()
    %148 = vector.extract_strided_slice %128 {offsets = [0, 0, 8], sizes = [2, 8, 8], strides = [1, 1, 1]} : vector<2x8x16xf32> to vector<2x8x8xf32>
    %149 = vector.extract_strided_slice %130 {offsets = [0, 0, 8], sizes = [2, 8, 8], strides = [1, 1, 1]} : vector<2x8x16xf32> to vector<2x8x8xf32>
    %150 = vector.extract_strided_slice %132 {offsets = [0, 0, 8], sizes = [2, 8, 8], strides = [1, 1, 1]} : vector<2x8x16xf32> to vector<2x8x8xf32>
    "tpu.trace_start"() <{level = 10 : i32, message = "bqd,bkd->bqk"}> : () -> ()
    %cst_46 = arith.constant dense<0.000000e+00> : vector<2x8x8xf32>
    %151 = tpu.matmul %148, %149, %cst_46 {dimension_numbers = #tpu.dot_dimension_numbers<[2], [2], [1], [1], [0, 0, 0, 1, 1, 1], [0], [0]>} : vector<2x8x8xf32>, vector<2x8x8xf32>, vector<2x8x8xf32> -> vector<2x8x8xf32>
    "tpu.trace_stop"() : () -> ()
    %cst_47 = arith.constant dense<0xFF800000> : vector<2x8xf32>
    %152 = vector.multi_reduction <maximumf>, %151, %cst_47 [2] : vector<2x8x8xf32> to vector<2x8xf32>
    %153 = vector.shape_cast %152 : vector<2x8xf32> to vector<2x8x1xf32>
    %154 = vector.broadcast %153 : vector<2x8x1xf32> to vector<2x8x8xf32>
    %155 = arith.subf %151, %154 : vector<2x8x8xf32>
    %156 = math.exp %155 : vector<2x8x8xf32>
    %cst_48 = arith.constant dense<0.000000e+00> : vector<2x8xf32>
    %157 = vector.multi_reduction <add>, %156, %cst_48 [2] : vector<2x8x8xf32> to vector<2x8xf32>
    %158 = vector.shape_cast %157 : vector<2x8xf32> to vector<2x8x1xf32>
    %159 = tpu.reciprocal %158 {approx = true} : vector<2x8x1xf32> -> vector<2x8x1xf32>
    %160 = vector.broadcast %159 : vector<2x8x1xf32> to vector<2x8x8xf32>
    %161 = arith.mulf %156, %160 : vector<2x8x8xf32>
    "tpu.trace_start"() <{level = 10 : i32, message = "bqk,bkd->bqd"}> : () -> ()
    %cst_49 = arith.constant dense<0.000000e+00> : vector<2x8x8xf32>
    %162 = tpu.matmul %161, %150, %cst_49 {dimension_numbers = #tpu.dot_dimension_numbers<[2], [1], [1], [2], [0, 0, 0, 1, 1, 2], [0], [0]>} : vector<2x8x8xf32>, vector<2x8x8xf32>, vector<2x8x8xf32> -> vector<2x8x8xf32>
    "tpu.trace_stop"() : () -> ()
    %163 = tpu.concatenate %147, %162 in 2 : vector<2x8x8xf32>, vector<2x8x8xf32> -> vector<2x8x16xf32>
    %164 = vector.shape_cast %163 : vector<2x8x16xf32> to vector<16x16xf32>
    %165 = vector.extract_strided_slice %120 {offsets = [0, 0], sizes = [16, 16], strides = [1, 1]} : vector<48x16xf32> to vector<16x16xf32>
    %cst_50 = arith.constant dense<0.000000e+00> : vector<16x16xf32>
    %166 = tpu.matmul %164, %165, %cst_50 {dimension_numbers = #tpu.dot_dimension_numbers<[1], [0], [0], [1], [0, 0, 1, 1], [], []>} : vector<16x16xf32>, vector<16x16xf32>, vector<16x16xf32> -> vector<16x16xf32>
    %167 = vector.extract_strided_slice %122 {offsets = [1, 0], sizes = [1, 16], strides = [1, 1]} : vector<8x48xf32> to vector<1x16xf32>
    %168 = vector.broadcast %167 : vector<1x16xf32> to vector<16x16xf32>
    %169 = arith.addf %166, %168 : vector<16x16xf32>
    %170 = arith.addf %116, %169 : vector<16x16xf32>
    %171 = vector.extract_strided_slice %122 {offsets = [2, 0], sizes = [1, 16], strides = [1, 1]} : vector<8x48xf32> to vector<1x16xf32>
    %172 = vector.extract_strided_slice %122 {offsets = [2, 16], sizes = [1, 16], strides = [1, 1]} : vector<8x48xf32> to vector<1x16xf32>
    %cst_51 = arith.constant dense<0.000000e+00> : vector<16xf32>
    %173 = vector.multi_reduction <add>, %170, %cst_51 [1] : vector<16x16xf32> to vector<16xf32>
    %174 = vector.shape_cast %173 : vector<16xf32> to vector<16x1xf32>
    %cst_52 = arith.constant 1.600000e+01 : f32
    %175 = vector.broadcast %cst_52 : f32 to vector<16x1xf32>
    %176 = arith.divf %174, %175 : vector<16x1xf32>
    %177 = vector.broadcast %176 : vector<16x1xf32> to vector<16x16xf32>
    %178 = arith.subf %170, %177 : vector<16x16xf32>
    %179 = arith.mulf %178, %178 : vector<16x16xf32>
    %cst_53 = arith.constant dense<0.000000e+00> : vector<16xf32>
    %180 = vector.multi_reduction <add>, %179, %cst_53 [1] : vector<16x16xf32> to vector<16xf32>
    %181 = vector.shape_cast %180 : vector<16xf32> to vector<16x1xf32>
    %cst_54 = arith.constant 1.600000e+01 : f32
    %182 = vector.broadcast %cst_54 : f32 to vector<16x1xf32>
    %183 = arith.divf %181, %182 : vector<16x1xf32>
    %184 = vector.broadcast %176 : vector<16x1xf32> to vector<16x16xf32>
    %185 = arith.subf %170, %184 : vector<16x16xf32>
    %cst_55 = arith.constant 9.99999974E-6 : f32
    %186 = vector.broadcast %cst_55 : f32 to vector<16x1xf32>
    %187 = arith.addf %183, %186 : vector<16x1xf32>
    %188 = math.rsqrt %187 : vector<16x1xf32>
    %189 = vector.broadcast %188 : vector<16x1xf32> to vector<16x16xf32>
    %190 = arith.mulf %185, %189 : vector<16x16xf32>
    %191 = vector.broadcast %171 : vector<1x16xf32> to vector<16x16xf32>
    %192 = arith.mulf %190, %191 : vector<16x16xf32>
    %193 = vector.broadcast %172 : vector<1x16xf32> to vector<16x16xf32>
    %194 = arith.addf %192, %193 : vector<16x16xf32>
    %195 = vector.extract_strided_slice %120 {offsets = [16, 0], sizes = [16, 16], strides = [1, 1]} : vector<48x16xf32> to vector<16x16xf32>
    %cst_56 = arith.constant dense<0.000000e+00> : vector<16x16xf32>
    %196 = tpu.matmul %194, %195, %cst_56 {dimension_numbers = #tpu.dot_dimension_numbers<[1], [0], [0], [1], [0, 0, 1, 1], [], []>} : vector<16x16xf32>, vector<16x16xf32>, vector<16x16xf32> -> vector<16x16xf32>
    %197 = vector.extract_strided_slice %122 {offsets = [1, 16], sizes = [1, 16], strides = [1, 1]} : vector<8x48xf32> to vector<1x16xf32>
    %198 = vector.broadcast %197 : vector<1x16xf32> to vector<16x16xf32>
    %199 = arith.addf %196, %198 : vector<16x16xf32>
    %cst_57 = arith.constant 0.000000e+00 : f32
    %200 = vector.broadcast %cst_57 : f32 to vector<16x16xf32>
    %201 = arith.maximumf %199, %200 : vector<16x16xf32>
    %202 = vector.extract_strided_slice %120 {offsets = [32, 0], sizes = [16, 16], strides = [1, 1]} : vector<48x16xf32> to vector<16x16xf32>
    %cst_58 = arith.constant dense<0.000000e+00> : vector<16x16xf32>
    %203 = tpu.matmul %201, %202, %cst_58 {dimension_numbers = #tpu.dot_dimension_numbers<[1], [0], [0], [1], [0, 0, 1, 1], [], []>} : vector<16x16xf32>, vector<16x16xf32>, vector<16x16xf32> -> vector<16x16xf32>
    %204 = vector.extract_strided_slice %122 {offsets = [1, 32], sizes = [1, 16], strides = [1, 1]} : vector<8x48xf32> to vector<1x16xf32>
    %205 = vector.broadcast %204 : vector<1x16xf32> to vector<16x16xf32>
    %206 = arith.addf %203, %205 : vector<16x16xf32>
    %207 = arith.addf %194, %206 : vector<16x16xf32>
    %208 = vector.extract_strided_slice %122 {offsets = [3, 0], sizes = [1, 16], strides = [1, 1]} : vector<8x48xf32> to vector<1x16xf32>
    %209 = vector.extract_strided_slice %122 {offsets = [3, 16], sizes = [1, 16], strides = [1, 1]} : vector<8x48xf32> to vector<1x16xf32>
    %cst_59 = arith.constant dense<0.000000e+00> : vector<16xf32>
    %210 = vector.multi_reduction <add>, %207, %cst_59 [1] : vector<16x16xf32> to vector<16xf32>
    %211 = vector.shape_cast %210 : vector<16xf32> to vector<16x1xf32>
    %cst_60 = arith.constant 1.600000e+01 : f32
    %212 = vector.broadcast %cst_60 : f32 to vector<16x1xf32>
    %213 = arith.divf %211, %212 : vector<16x1xf32>
    %214 = vector.broadcast %213 : vector<16x1xf32> to vector<16x16xf32>
    %215 = arith.subf %207, %214 : vector<16x16xf32>
    %216 = arith.mulf %215, %215 : vector<16x16xf32>
    %cst_61 = arith.constant dense<0.000000e+00> : vector<16xf32>
    %217 = vector.multi_reduction <add>, %216, %cst_61 [1] : vector<16x16xf32> to vector<16xf32>
    %218 = vector.shape_cast %217 : vector<16xf32> to vector<16x1xf32>
    %cst_62 = arith.constant 1.600000e+01 : f32
    %219 = vector.broadcast %cst_62 : f32 to vector<16x1xf32>
    %220 = arith.divf %218, %219 : vector<16x1xf32>
    %221 = vector.broadcast %213 : vector<16x1xf32> to vector<16x16xf32>
    %222 = arith.subf %207, %221 : vector<16x16xf32>
    %cst_63 = arith.constant 9.99999974E-6 : f32
    %223 = vector.broadcast %cst_63 : f32 to vector<16x1xf32>
    %224 = arith.addf %220, %223 : vector<16x1xf32>
    %225 = math.rsqrt %224 : vector<16x1xf32>
    %226 = vector.broadcast %225 : vector<16x1xf32> to vector<16x16xf32>
    %227 = arith.mulf %222, %226 : vector<16x16xf32>
    %228 = vector.broadcast %208 : vector<1x16xf32> to vector<16x16xf32>
    %229 = arith.mulf %227, %228 : vector<16x16xf32>
    %230 = vector.broadcast %209 : vector<1x16xf32> to vector<16x16xf32>
    %231 = arith.addf %229, %230 : vector<16x16xf32>
    %c0_64 = arith.constant 0 : index
    %c0_65 = arith.constant 0 : index
    %232 = vector.load %arg5[%c0_64, %c0_65] : memref<88x64xf32, #tpu.memory_space<vmem>>, vector<88x64xf32>
    %233 = vector.extract_strided_slice %232 {offsets = [0, 0], sizes = [16, 64], strides = [1, 1]} : vector<88x64xf32> to vector<16x64xf32>
    %234 = vector.extract_strided_slice %232 {offsets = [16, 0], sizes = [64, 64], strides = [1, 1]} : vector<88x64xf32> to vector<64x64xf32>
    %235 = vector.extract_strided_slice %232 {offsets = [80, 0], sizes = [1, 64], strides = [1, 1]} : vector<88x64xf32> to vector<1x64xf32>
    %236 = vector.extract_strided_slice %232 {offsets = [81, 0], sizes = [1, 64], strides = [1, 1]} : vector<88x64xf32> to vector<1x64xf32>
    %cst_66 = arith.constant dense<0.000000e+00> : vector<16x64xf32>
    %237 = tpu.matmul %231, %233, %cst_66 {dimension_numbers = #tpu.dot_dimension_numbers<[1], [0], [0], [1], [0, 0, 1, 1], [], []>} : vector<16x16xf32>, vector<16x64xf32>, vector<16x64xf32> -> vector<16x64xf32>
    %238 = vector.broadcast %235 : vector<1x64xf32> to vector<16x64xf32>
    %239 = arith.addf %237, %238 : vector<16x64xf32>
    %cst_67 = arith.constant dense<0.000000e+00> : vector<16x64xf32>
    %240 = tpu.matmul %239, %234, %cst_67 {dimension_numbers = #tpu.dot_dimension_numbers<[1], [0], [0], [1], [0, 0, 1, 1], [], []>} : vector<16x64xf32>, vector<64x64xf32>, vector<16x64xf32> -> vector<16x64xf32>
    %241 = vector.broadcast %236 : vector<1x64xf32> to vector<16x64xf32>
    %242 = arith.addf %240, %241 : vector<16x64xf32>
    %243 = vector.extract_strided_slice %242 {offsets = [0, 0], sizes = [16, 2], strides = [1, 1]} : vector<16x64xf32> to vector<16x2xf32>
    %cst_68 = arith.constant dense<0xFF800000> : vector<16xf32>
    %244 = vector.multi_reduction <maximumf>, %243, %cst_68 [1] : vector<16x2xf32> to vector<16xf32>
    %245 = vector.shape_cast %244 : vector<16xf32> to vector<16x1xf32>
    %246 = vector.broadcast %245 : vector<16x1xf32> to vector<16x2xf32>
    %247 = arith.subf %243, %246 : vector<16x2xf32>
    %248 = math.exp %247 : vector<16x2xf32>
    %cst_69 = arith.constant dense<0.000000e+00> : vector<16xf32>
    %249 = vector.multi_reduction <add>, %248, %cst_69 [1] : vector<16x2xf32> to vector<16xf32>
    %250 = vector.shape_cast %249 : vector<16xf32> to vector<16x1xf32>
    %251 = vector.broadcast %250 : vector<16x1xf32> to vector<16x2xf32>
    %252 = arith.divf %248, %251 : vector<16x2xf32>
    %253 = vector.shape_cast %252 : vector<16x2xf32> to vector<2x8x2xf32>
    %c0_70 = arith.constant 0 : index
    %c0_71 = arith.constant 0 : index
    %c0_72 = arith.constant 0 : index
    %254 = vector.load %arg6[%c0_70, %c0_71, %c0_72] : memref<2x8x2xf32, #tpu.memory_space<vmem>>, vector<2x8x2xf32>
    tpu.vector_store %arg6[%c0_70, %c0_71, %c0_72], %253 {strides = array<i32>} : memref<2x8x2xf32, #tpu.memory_space<vmem>>, vector<2x8x2xf32>,
    return
  }
  func.func @transform_0(%arg0: i32) -> (i32, i32, i32) {
    %c0_i32 = arith.constant 0 : i32
    %c0_i32_0 = arith.constant 0 : i32
    %c0_i32_1 = arith.constant 0 : i32
    return %arg0, %c0_i32, %c0_i32_0 : i32, i32, i32
  }
  func.func @transform_1(%arg0: i32) -> (i32, i32, i32) {
    %c0_i32 = arith.constant 0 : i32
    %c0_i32_0 = arith.constant 0 : i32
    %c0_i32_1 = arith.constant 0 : i32
    %c0_i32_2 = arith.constant 0 : i32
    return %c0_i32, %c0_i32_0, %c0_i32_1 : i32, i32, i32
  }
  func.func @transform_2(%arg0: i32) -> (i32, i32, i32) {
    %c0_i32 = arith.constant 0 : i32
    %c0_i32_0 = arith.constant 0 : i32
    %c0_i32_1 = arith.constant 0 : i32
    %c0_i32_2 = arith.constant 0 : i32
    return %c0_i32, %c0_i32_0, %c0_i32_1 : i32, i32, i32
  }
  func.func @transform_3(%arg0: i32) -> (i32, i32, i32) {
    %c0_i32 = arith.constant 0 : i32
    %c0_i32_0 = arith.constant 0 : i32
    %c0_i32_1 = arith.constant 0 : i32
    %c0_i32_2 = arith.constant 0 : i32
    return %c0_i32, %c0_i32_0, %c0_i32_1 : i32, i32, i32
  }
  func.func @transform_4(%arg0: i32) -> (i32, i32) {
    %c0_i32 = arith.constant 0 : i32
    %c0_i32_0 = arith.constant 0 : i32
    %c0_i32_1 = arith.constant 0 : i32
    return %c0_i32, %c0_i32_0 : i32, i32
  }
  func.func @transform_5(%arg0: i32) -> (i32, i32, i32) {
    %c0_i32 = arith.constant 0 : i32
    %c0_i32_0 = arith.constant 0 : i32
    %c0_i32_1 = arith.constant 0 : i32
    return %arg0, %c0_i32, %c0_i32_0 : i32, i32, i32
  }
}

</mosaic_0001>

<bundles_post_ra>
// kernel: tpu_custom_call.1
= control target key start
LH: loop header
LB: loop body
LE: loop exit
PB: predicated region body
PF: predicated region fallthrough
CT: control target
= control target key end

     0   :  { %vm35_vm0 = vcmask 130048   ;;  %v2792_v4 = vmov 0.0   ;;  %v31_v5 = vlaneseq  ;;  %vm2793_vm1 = vmmov 0   ;;  %s2794_s27 = smov 112   ;;  %s2795_s28 = smov 96   ;;  %s3177_s1 = inlined_call_operand.vmem [shape: f32[2,16,48], index: 1, kind: input, shape index: {}]   ;;  %s3178_s0 = inlined_call_operand.vmem [shape: f32[2,8,16], index: 0, kind: input, shape index: {}]   ;;  %s3179_s3 = inlined_call_operand.vmem [shape: f32[2,8,48], index: 3, kind: input, shape index: {}]   ;;  %s3180_s2 = inlined_call_operand.vmem [shape: f32[2,48,16], index: 2, kind: input, shape index: {}]   ;;  %s3181_s4 = inlined_call_operand.vmem [shape: f32[88,64], index: 4, kind: input, shape index: {}]   ;;  %s3182_s5 = inlined_call_operand.vmem [shape: f32[2,8,2], index: 5, kind: output, shape index: {}]  }
   0x1   :  { %v23_v0 = vld [vmem:[%s3177_s1 + $0x8] sm:$0xff]  ;;  %v22_v1 = vld [vmem:[%s3177_s1] sm:$0xff]  ;;  %2583 = vmatprep.subr.mxu1 %v2792_v4  ;;  %2585 = vmatprep.mubr.msk.f32.mxu1 %vm2793_vm1, %v2792_v4  ;;  %vm120_vm2 = vcmask 64512   ;;  %s2796_s29 = smov 104   ;;  %s2797_s30 = smov 120   ;;  %vm2324_vm3 = vcmask 523264  }
   0x2   :  { %v2839_v2 = vld [vmem:[%s3178_s0] sm:$0xff]  ;;  %2566 = vmatprep.subr.mxu0 %v23_v0  ;;  %v2846_v3 = vld [vmem:[%s3178_s0 + $0x8] sm:$0xff]  ;;  %v2852_v6 = vshrl.u32 %v31_v5, 7  ;;  %s2798_s6 = smov 88   ;;  %s2799_s11 = smov 8   ;;  %vm2406_vm4 = vcmask 15360  }
   0x3   :  { %2570 = vmatprep.mubr.msk.f32.mxu0 %vm35_vm0, %v2839_v2  ;;  %2567 = vmatpush3.msra.mxu0 %v23_v0  ;;  %v2864_v8 = vld [vmem:[%s3179_s3] sm:$0xff] }
   0x4   :  { %2568 = vmatprep.subr.mxu0 %v22_v1  ;;  %v2859_v7 = vsub.s32 0, %v2852_v6 }
   0x5   :  { %2569 = vmatpush3.msra.mxu0 %v22_v1 }
   0x6   :  { %2571 = vmatmul.mubr.msk.f32.vlgmr.msra.gmra.mxu0 %vm35_vm0, %v2846_v3  ;;  %2573 = vmatprep.subr.mxu0 %v2792_v4  ;;  %v34_v10 = vrot.slane %v2864_v8, %v2859_v7 }
   0x7   :  { %2575 = vmatprep.mubr.msk.f32.mxu0 %vm2793_vm1, %v2792_v4 }
  0xc6   :  { %v2572_v9 = vpop.f32.mrf.mxu0 }
  0xc7   :  { %v2872_v13 = vadd.f32 %v2572_v9, %v34_v10 }
  0xc8   :  { %v108_v11 = vpop.f32.mrf.mxu0 }
  0xc9   :  { %v2868_v12 = vadd.f32 %v108_v11, %v34_v10 }
  0xcb   :  { %118 = vrot.lane.b32.xlu0 %v2868_v12, %s2794_s27 }
  0xcf   :  { %196 = vrot.lane.b32.xlu0 %v2872_v13, %s2794_s27 }
 0x13d   :  { %v119_v14 = vpop.permute.xlu0 %118 }
 0x13e   :  { %2574 = vmatpush3.xpose.msk.msra.mxu0 %vm120_vm2, %v119_v14 }
 0x13f   :  { %2578 = vmatprep.subr.mxu0 %v2792_v4 }
 0x141   :  { %2576 = vmatmul.mubr.msk.f32.vlgmr.msra.gmra.mxu0 %vm120_vm2, %v2868_v12  ;;  %v197_v15 = vpop.permute.xlu0 %196 }
 0x142   :  { %2579 = vmatpush3.xpose.msk.msra.mxu0 %vm120_vm2, %v197_v15  ;;  %2580 = vmatprep.mubr.msk.f32.mxu0 %vm2793_vm1, %v2792_v4  ;;  %v25_v15 = vld [vmem:[%s3180_s2 + $0x8] sm:$0xff] }
 0x143   :  { %2588 = vmatprep.subr.mxu0 %v2792_v4 }
 0x145   :  { %2581 = vmatmul.mubr.msk.f32.vlgmr.msra.gmra.mxu0 %vm120_vm2, %v2872_v13 }
 0x146   :  { %2590 = vmatprep.mubr.msk.f32.mxu0 %vm2793_vm1, %v2792_v4 }
 0x201   :  { %v191_v16 = vpop.f32.mrf.mxu0 }
 0x202   :  { %v272_v17 = vsel %vm120_vm2, %v191_v16, -inf }
 0x203   :  { %273 = vmax.xlane.f32.xlu1 %v272_v17  ;;  %v2577_v18 = vpop.f32.mrf.mxu0 }
 0x205   :  { %v268_v19 = vpop.f32.mrf.mxu0 }
 0x206   :  { %v275_v20 = vsel %vm120_vm2, %v268_v19, -inf }
 0x207   :  { %276 = vmax.xlane.f32.xlu1 %v275_v20  ;;  %v2582_v21 = vpop.f32.mrf.mxu0 }
 0x218   :  { %294 = vrot.lane.b32.xlu1 %v2868_v12, %s2795_s28 }
 0x21c   :  { %370 = vrot.lane.b32.xlu1 %v2872_v13, %s2795_s28 }
 0x220   :  { %448 = vrot.lane.b32.xlu1 %v2868_v12, %s2796_s29 }
 0x224   :  { %526 = vrot.lane.b32.xlu1 %v2872_v13, %s2796_s29 }
 0x28c   :  { %v274_v22 = vpop.xlane.xlu1 %273 }
 0x28d   :  { %v278_v23 = vsub.f32 %v191_v16, %v274_v22 }
 0x28f   :  { %v280_v24 = vmul.f32 1.442695, %v278_v23 }
 0x290   :  { %v277_v25 = vpop.xlane.xlu1 %276 }
 0x291   :  { %2736 = vpow2.f32 %v280_v24  ;;  %v279_v26 = vsub.f32 %v268_v19, %v277_v25  ;;  %v2945_v24 = vsub.s32 1, %v2852_v6 }
 0x293   :  { %v282_v27 = vmul.f32 1.442695, %v279_v26  ;;  %v789_v25 = vrot.slane %v2864_v8, %v2945_v24 }
 0x294   :  { %v295_v28 = vpop.permute.xlu1 %294 }
 0x295   :  { %2738 = vpow2.f32 %v282_v27  ;;  %2584 = vmatpush3.msra.mxu1 %v295_v28 }
 0x296   :  { %2593 = vmatprep.subr.mxu1 %v2792_v4 }
 0x298   :  { %v371_v29 = vpop.permute.xlu1 %370 }
 0x299   :  { %2589 = vmatpush3.msra.mxu0 %v371_v29 }
 0x29a   :  { %2598 = vmatprep.subr.mxu0 %v2792_v4 }
 0x29c   :  { %v449_v34 = vpop.permute.xlu1 %448 }
 0x29e   :  { %v2737_v30 = vpop.eup %2736 }
 0x29f   :  { %v284_v31 = vsel %vm120_vm2, %v2737_v30, 0.0 }
 0x2a0   :  { %285 = vadd.xlane.f32.xlu0 %v284_v31  ;;  %v527_v35 = vpop.permute.xlu1 %526 }
 0x2a2   :  { %v2739_v32 = vpop.eup %2738 }
 0x2a3   :  { %v287_v33 = vsel %vm120_vm2, %v2739_v32, 0.0 }
 0x2a4   :  { %288 = vadd.xlane.f32.xlu1 %v287_v33 }
 0x2b5   :  { %524 = vrot.lane.b32.xlu1 %v2872_v13, %s2797_s30 }
 0x2b6   :  { %446 = vrot.lane.b32.xlu0 %v2868_v12, %s2797_s30 }
 0x329   :  { %v286_v36 = vpop.xlane.xlu0 %285 }
 0x32a   :  { %2740 = vrcp.f32 %v286_v36 }
 0x32d   :  { %v289_v37 = vpop.xlane.xlu1 %288  ;;  %v447_v42 = vpop.permute.xlu0 %446 }
 0x32e   :  { %2742 = vrcp.f32 %v289_v37 }
 0x331   :  { %v525_v43 = vpop.permute.xlu1 %524 }
 0x337   :  { %v2741_v38 = vpop.eup %2740 }
 0x338   :  { %v292_v39 = vmul.f32 %v2741_v38, %v2737_v30 }
 0x33a   :  { %2586 = vmatmul.mubr.msk.f32.vlgmr.msra.gmra.mxu1 %vm120_vm2, %v292_v39 }
 0x33b   :  { %v2743_v40 = vpop.eup %2742  ;;  %2594 = vmatpush3.xpose.msk.msra.mxu1 %vm120_vm2, %v449_v34  ;;  %2595 = vmatprep.mubr.msk.f32.mxu1 %vm2793_vm1, %v2792_v4  ;;  %v902_v34 = vsub.s32 2, %v2852_v6 }
 0x33c   :  { %v293_v41 = vmul.f32 %v2743_v40, %v2739_v32  ;;  %2603 = vmatprep.subr.mxu1 %v2792_v4 }
 0x33e   :  { %2591 = vmatmul.mubr.msk.f32.vlgmr.msra.gmra.mxu0 %vm120_vm2, %v293_v41  ;;  %2596 = vmatmul.mubr.msk.f32.vlgmr.msra.gmra.mxu1 %vm120_vm2, %v447_v42 }
 0x33f   :  { %2599 = vmatpush3.xpose.msk.msra.mxu0 %vm120_vm2, %v527_v35  ;;  %2600 = vmatprep.mubr.msk.f32.mxu0 %vm2793_vm1, %v2792_v4  ;;  %v903_v35 = vrot.slane %v2864_v8, %v902_v34 }
 0x340   :  { %2608 = vmatprep.subr.mxu0 %v2792_v4  ;;  %2605 = vmatprep.mubr.msk.f32.mxu1 %vm2793_vm1, %v2792_v4 }
 0x342   :  { %2601 = vmatmul.mubr.msk.f32.vlgmr.msra.gmra.mxu0 %vm120_vm2, %v525_v43 }
 0x343   :  { %2610 = vmatprep.mubr.msk.f32.mxu0 %vm2793_vm1, %v2792_v4 }
 0x3fa   :  { %v366_v44 = vpop.f32.mrf.mxu1 }
 0x3fc   :  { %v2587_v45 = vpop.f32.mrf.mxu1 }
 0x3fd   :  { %v26_v45 = vld [vmem:[%s3180_s2 + $0x10] sm:$0xff] }
 0x3fe   :  { %v442_v46 = vpop.f32.mrf.mxu0  ;;  %v520_v47 = vpop.f32.mrf.mxu1 }
 0x3ff   :  { %v602_v48 = vsel %vm120_vm2, %v520_v47, -inf }
 0x400   :  { %v2592_v49 = vpop.f32.mrf.mxu0  ;;  %603 = vmax.xlane.f32.xlu1 %v602_v48  ;;  %v2597_v50 = vpop.f32.mrf.mxu1 }
 0x402   :  { %v598_v51 = vpop.f32.mrf.mxu0 }
 0x403   :  { %v605_v52 = vsel %vm120_vm2, %v598_v51, -inf }
 0x404   :  { %606 = vmax.xlane.f32.xlu0 %v605_v52  ;;  %v2602_v53 = vpop.f32.mrf.mxu0 }
 0x41a   :  { %700 = vrot.lane.b32.xlu0 %v2872_v13, %s2798_s6 }
 0x489   :  { %v604_v54 = vpop.xlane.xlu1 %603 }
 0x48a   :  { %v608_v55 = vsub.f32 %v520_v47, %v604_v54 }
 0x48c   :  { %v610_v56 = vmul.f32 1.442695, %v608_v55 }
 0x48d   :  { %v607_v57 = vpop.xlane.xlu0 %606 }
 0x48e   :  { %2744 = vpow2.f32 %v610_v56  ;;  %v609_v58 = vsub.f32 %v598_v51, %v607_v57 }
 0x490   :  { %v612_v59 = vmul.f32 1.442695, %v609_v58 }
 0x491   :  { %v701_v60 = vpop.permute.xlu0 %700 }
 0x492   :  { %2746 = vpow2.f32 %v612_v59  ;;  %2609 = vmatpush3.msra.mxu0 %v701_v60 }
 0x49b   :  { %v2745_v61 = vpop.eup %2744 }
 0x49c   :  { %v614_v62 = vsel %vm120_vm2, %v2745_v61, 0.0 }
 0x49d   :  { %615 = vadd.xlane.f32.xlu1 %v614_v62  ;;  %v28_v62 = vld [vmem:[%s3180_s2 + $0x20] sm:$0xff] }
 0x49f   :  { %v2747_v63 = vpop.eup %2746 }
 0x4a0   :  { %v617_v0 = vsel %vm120_vm2, %v2747_v63, 0.0 }
 0x4a1   :  { %618 = vadd.xlane.f32.xlu1 %v617_v0 }
 0x4b2   :  { %624 = vrot.lane.b32.xlu1 %v2868_v12, %s2798_s6  ;;  %v24_v12 = vld [vmem:[%s3180_s2] sm:$0xff] }
 0x526   :  { %v616_v1 = vpop.xlane.xlu1 %615 }
 0x527   :  { %2748 = vrcp.f32 %v616_v1 }
 0x52a   :  { %v619_v5 = vpop.xlane.xlu1 %618 }
 0x52b   :  { %2750 = vrcp.f32 %v619_v5 }
 0x52e   :  { %v625_v9 = vpop.permute.xlu1 %624 }
 0x52f   :  { %2604 = vmatpush3.msra.mxu1 %v625_v9 }
 0x530   :  { %2613 = vmatprep.subr.mxu1 %v25_v15 }
 0x534   :  { %v2749_v10 = vpop.eup %2748 }
 0x535   :  { %v622_v11 = vmul.f32 %v2749_v10, %v2745_v61  ;;  %v29_v61 = vld [vmem:[%s3180_s2 + $0x28] sm:$0xff] }
 0x537   :  { %2606 = vmatmul.mubr.msk.f32.vlgmr.msra.gmra.mxu1 %vm120_vm2, %v622_v11 }
 0x538   :  { %v2751_v13 = vpop.eup %2750  ;;  %2614 = vmatpush3.msra.mxu1 %v25_v15 }
 0x539   :  { %v623_v14 = vmul.f32 %v2751_v13, %v2747_v63  ;;  %2615 = vmatprep.subr.mxu1 %v24_v12 }
 0x53a   :  { %2616 = vmatpush3.msra.mxu1 %v24_v12 }
 0x53b   :  { %2611 = vmatmul.mubr.msk.f32.vlgmr.msra.gmra.mxu0 %vm120_vm2, %v623_v14  ;;  %2627 = vmatprep.subr.mxu1 %v29_v61 }
 0x5f7   :  { %v696_v16 = vpop.f32.mrf.mxu1 }
 0x5f8   :  { %778 = vrot.lane.b32.xlu1 %v696_v16, %s2799_s11 }
 0x5f9   :  { %v2607_v17 = vpop.f32.mrf.mxu1 }
 0x5fb   :  { %v772_v18 = vpop.f32.mrf.mxu0 }
 0x5fc   :  { %780 = vrot.lane.b32.xlu1 %v772_v18, %s2799_s11 }
 0x5fd   :  { %v2612_v19 = vpop.f32.mrf.mxu0 }
 0x66a   :  { %v779_v20 = vpop.permute.xlu1 %778 }
 0x66b   :  { %v784_v21 = vsel %vm120_vm2, %v366_v44, %v779_v20  ;;  %v27_v44 = vld [vmem:[%s3180_s2 + $0x18] sm:$0xff] }
 0x66c   :  { %2617 = vmatprep.mubr.msk.f32.mxu1 %vm35_vm0, %v784_v21  ;;  %2620 = vmatprep.subr.mxu0 %v27_v44 }
 0x66d   :  { %2621 = vmatpush3.msra.mxu0 %v27_v44 }
 0x66e   :  { %v781_v22 = vpop.permute.xlu1 %780  ;;  %2622 = vmatprep.subr.mxu0 %v26_v45 }
 0x66f   :  { %v785_v23 = vsel %vm120_vm2, %v442_v46, %v781_v22  ;;  %2623 = vmatpush3.msra.mxu0 %v26_v45 }
 0x670   :  { %2618 = vmatmul.mubr.msk.f32.vlgmr.msra.gmra.mxu1 %vm35_vm0, %v785_v23 }
 0x671   :  { %2628 = vmatpush3.msra.mxu1 %v29_v61 }
 0x672   :  { %2629 = vmatprep.subr.mxu1 %v28_v62 }
 0x673   :  { %2630 = vmatpush3.msra.mxu1 %v28_v62 }
 0x674   :  { %2641 = vmatprep.subr.mxu1 %v2792_v4 }
 0x730   :  { %v2619_v26 = vpop.f32.mrf.mxu1 }
 0x731   :  { %v868_v27 = vadd.f32 %v2619_v26, %v789_v25 }
 0x732   :  { %v862_v28 = vpop.f32.mrf.mxu1 }
 0x733   :  { %v863_v29 = vadd.f32 %v862_v28, %v789_v25  ;;  %v872_v30 = vadd.f32 %v868_v27, %v2846_v3 }
 0x735   :  { %v876_v31 = vsel %vm35_vm0, %v872_v30, 0.0  ;;  %v871_v32 = vadd.f32 %v863_v29, %v2839_v2 }
 0x736   :  { %877 = vadd.xlane.f32.xlu1 %v876_v31 }
 0x737   :  { %v873_v33 = vsel %vm35_vm0, %v871_v32, 0.0 }
 0x738   :  { %874 = vadd.xlane.f32.xlu0 %v873_v33 }
 0x747   :  { %907 = vrot.lane.b32.xlu1 %v903_v35, %s2794_s27 }
 0x74b   :  { %999 = vrot.lane.b32.xlu1 %v789_v25, %s2795_s28 }
 0x7bf   :  { %v878_v36 = vpop.xlane.xlu1 %877 }
 0x7c0   :  { %v881_v3 = vmul.f32 0.0625, %v878_v36  ;;  %v2455_v36 = vld [vmem:[%s3177_s1 + $0x10] sm:$0xff] }
 0x7c1   :  { %v875_v37 = vpop.xlane.xlu0 %874 }
 0x7c2   :  { %v880_v38 = vmul.f32 0.0625, %v875_v37  ;;  %v883_v39 = vsub.f32 %v872_v30, %v881_v3 }
 0x7c3   :  { %v908_v54 = vpop.permute.xlu1 %907 }
 0x7c4   :  { %v882_v2 = vsub.f32 %v871_v32, %v880_v38  ;;  %v885_v42 = vmul.f32 %v883_v39, %v883_v39  ;;  %v1113_v32 = vsub.s32 3, %v2852_v6  ;;  %v2233_v6 = vld [vmem:[%s3181_s4 + $0x48] sm:$0xff] }
 0x7c6   :  { %v884_v40 = vmul.f32 %v882_v2, %v882_v2  ;;  %v889_v43 = vsel %vm35_vm0, %v885_v42, 0.0  ;;  %v1114_v33 = vrot.slane %v2864_v8, %v1113_v32 }
 0x7c7   :  { %v1000_v13 = vpop.permute.xlu1 %999 }
 0x7c8   :  { %v886_v41 = vsel %vm35_vm0, %v884_v40, 0.0 }
 0x7c9   :  { %887 = vadd.xlane.f32.xlu0 %v886_v41 }
 0x7cd   :  { %890 = vadd.xlane.f32.xlu0 %v889_v43 }
 0x7e3   :  { %913 = vrot.lane.b32.xlu0 %v789_v25, %s2794_s27 }
 0x852   :  { %v888_v46 = vpop.xlane.xlu0 %887 }
 0x853   :  { %v892_v47 = vmul.f32 0.0625, %v888_v46 }
 0x855   :  { %v894_v48 = vadd.f32 1e-05, %v892_v47 }
 0x856   :  { %v891_v49 = vpop.xlane.xlu0 %890 }
 0x857   :  { %2752 = vrsqrt.f32 %v894_v48  ;;  %v893_v50 = vmul.f32 0.0625, %v891_v49  ;;  %v3010_v49 = vld [vmem:[%s3179_s3 + $0x8] sm:$0xff] }
 0x859   :  { %v895_v51 = vadd.f32 1e-05, %v893_v50 }
 0x85a   :  { %v914_v63 = vpop.permute.xlu0 %913 }
 0x85b   :  { %2754 = vrsqrt.f32 %v895_v51  ;;  %v1138_v51 = vrot.slane %v3010_v49, %v2859_v7 }
 0x864   :  { %v2753_v52 = vpop.eup %2752 }
 0x865   :  { %v898_v53 = vmul.f32 %v2753_v52, %v882_v2 }
 0x867   :  { %v904_v55 = vmul.f32 %v903_v35, %v898_v53 }
 0x868   :  { %v2755_v56 = vpop.eup %2754 }
 0x869   :  { %v899_v57 = vmul.f32 %v2755_v56, %v883_v39  ;;  %v910_v58 = vadd.f32 %v908_v54, %v904_v55 }
 0x86b   :  { %v905_v59 = vmul.f32 %v903_v35, %v899_v57  ;;  %2624 = vmatprep.mubr.msk.f32.mxu0 %vm35_vm0, %v910_v58  ;;  %v2456_v35 = vld [vmem:[%s3177_s1 + $0x18] sm:$0xff] }
 0x86c   :  { %2634 = vmatprep.subr.mxu0 %v2456_v35 }
 0x86d   :  { %v911_v60 = vadd.f32 %v908_v54, %v905_v59 }
 0x86f   :  { %2625 = vmatmul.mubr.msk.f32.vlgmr.msra.gmra.mxu0 %vm35_vm0, %v911_v60 }
 0x870   :  { %2635 = vmatpush3.msra.mxu0 %v2456_v35 }
 0x871   :  { %2636 = vmatprep.subr.mxu0 %v2455_v36 }
 0x872   :  { %2637 = vmatpush3.msra.mxu0 %v2455_v36 }
 0x873   :  { %2646 = vmatprep.subr.mxu0 %v2792_v4 }
 0x92f   :  { %v2626_v0 = vpop.f32.mrf.mxu0 }
 0x930   :  { %v994_v1 = vadd.f32 %v2626_v0, %v914_v63 }
 0x931   :  { %v988_v5 = vpop.f32.mrf.mxu0 }
 0x932   :  { %v989_v9 = vadd.f32 %v988_v5, %v914_v63  ;;  %v998_v11 = vmax.f32 %v994_v1, 0.0 }
 0x934   :  { %v997_v10 = vmax.f32 %v989_v9, 0.0 }
 0x936   :  { %2631 = vmatprep.mubr.msk.f32.mxu1 %vm35_vm0, %v997_v10 }
 0x937   :  { %2632 = vmatmul.mubr.msk.f32.vlgmr.msra.gmra.mxu1 %vm35_vm0, %v998_v11 }
 0x938   :  { %2643 = vmatprep.mubr.msk.f32.mxu1 %vm2793_vm1, %v2792_v4 }
 0x9f7   :  { %v2633_v14 = vpop.f32.mrf.mxu1 }
 0x9f8   :  { %v1080_v15 = vadd.f32 %v2633_v14, %v1000_v13 }
 0x9f9   :  { %v1074_v12 = vpop.f32.mrf.mxu1 }
 0x9fa   :  { %v1075_v16 = vadd.f32 %v1074_v12, %v1000_v13  ;;  %v1084_v17 = vadd.f32 %v1080_v15, %v911_v60 }
 0x9fc   :  { %v1088_v18 = vsel %vm35_vm0, %v1084_v17, 0.0  ;;  %v1083_v19 = vadd.f32 %v1075_v16, %v910_v58 }
 0x9fd   :  { %1089 = vadd.xlane.f32.xlu0 %v1088_v18 }
 0x9fe   :  { %v1085_v20 = vsel %vm35_vm0, %v1083_v19, 0.0 }
 0x9ff   :  { %1086 = vadd.xlane.f32.xlu1 %v1085_v20 }
 0xa86   :  { %v1090_v21 = vpop.xlane.xlu0 %1089 }
 0xa87   :  { %v1092_v22 = vmul.f32 0.0625, %v1090_v21 }
 0xa88   :  { %v1087_v23 = vpop.xlane.xlu1 %1086 }
 0xa89   :  { %v1094_v25 = vsub.f32 %v1084_v17, %v1092_v22  ;;  %v1091_v26 = vmul.f32 0.0625, %v1087_v23 }
 0xa8b   :  { %v1093_v27 = vsub.f32 %v1083_v19, %v1091_v26  ;;  %v1096_v28 = vmul.f32 %v1094_v25, %v1094_v25 }
 0xa8d   :  { %v1100_v29 = vsel %vm35_vm0, %v1096_v28, 0.0  ;;  %v1095_v30 = vmul.f32 %v1093_v27, %v1093_v27 }
 0xa8e   :  { %1101 = vadd.xlane.f32.xlu1 %v1100_v29 }
 0xa8f   :  { %v1097_v31 = vsel %vm35_vm0, %v1095_v30, 0.0 }
 0xa90   :  { %1098 = vadd.xlane.f32.xlu0 %v1097_v31 }
 0xaa6   :  { %1118 = vrot.lane.b32.xlu0 %v1114_v33, %s2794_s27 }
 0xb17   :  { %v1102_v3 = vpop.xlane.xlu1 %1101 }
 0xb18   :  { %v1104_v37 = vmul.f32 0.0625, %v1102_v3 }
 0xb19   :  { %v1099_v38 = vpop.xlane.xlu0 %1098 }
 0xb1a   :  { %v1106_v8 = vadd.f32 1e-05, %v1104_v37  ;;  %v1103_v39 = vmul.f32 0.0625, %v1099_v38 }
 0xb1c   :  { %2756 = vrsqrt.f32 %v1106_v8  ;;  %v1105_v2 = vadd.f32 1e-05, %v1103_v39 }
 0xb1d   :  { %v1119_v46 = vpop.permute.xlu0 %1118 }
 0xb1e   :  { %2758 = vrsqrt.f32 %v1105_v2 }
 0xb29   :  { %v2757_v40 = vpop.eup %2756 }
 0xb2a   :  { %v1110_v41 = vmul.f32 %v2757_v40, %v1094_v25 }
 0xb2b   :  { %v2759_v42 = vpop.eup %2758 }
 0xb2c   :  { %v1109_v43 = vmul.f32 %v2759_v42, %v1093_v27  ;;  %v1116_v44 = vmul.f32 %v1114_v33, %v1110_v41 }
 0xb2e   :  { %v1115_v45 = vmul.f32 %v1114_v33, %v1109_v43  ;;  %v2999_v48 = vadd.f32 %v1119_v46, %v1116_v44 }
 0xb30   :  { %v2997_v47 = vadd.f32 %v1119_v46, %v1115_v45 }
 0xb32   :  { %2638 = vmatprep.mubr.msk.f32.mxu0 %vm35_vm0, %v2997_v47 }
 0xb33   :  { %2639 = vmatmul.mubr.msk.f32.vlgmr.msra.gmra.mxu0 %vm35_vm0, %v2999_v48 }
 0xb34   :  { %2648 = vmatprep.mubr.msk.f32.mxu0 %vm2793_vm1, %v2792_v4 }
 0xbf3   :  { %v2640_v50 = vpop.f32.mrf.mxu0 }
 0xbf4   :  { %v3018_v54 = vadd.f32 %v2640_v50, %v1138_v51 }
 0xbf5   :  { %v1211_v52 = vpop.f32.mrf.mxu0 }
 0xbf6   :  { %v3014_v53 = vadd.f32 %v1211_v52, %v1138_v51 }
 0xbf8   :  { %1221 = vrot.lane.b32.xlu1 %v3014_v53, %s2794_s27 }
 0xbfc   :  { %1298 = vrot.lane.b32.xlu1 %v3018_v54, %s2794_s27 }
 0xc6a   :  { %v1222_v55 = vpop.permute.xlu1 %1221 }
 0xc6b   :  { %2642 = vmatpush3.xpose.msk.msra.mxu1 %vm120_vm2, %v1222_v55 }
 0xc6c   :  { %2651 = vmatprep.subr.mxu1 %v2792_v4 }
 0xc6e   :  { %2644 = vmatmul.mubr.msk.f32.vlgmr.msra.gmra.mxu1 %vm120_vm2, %v3014_v53  ;;  %v1299_v56 = vpop.permute.xlu1 %1298 }
 0xc6f   :  { %2647 = vmatpush3.xpose.msk.msra.mxu0 %vm120_vm2, %v1299_v56  ;;  %2653 = vmatprep.mubr.msk.f32.mxu1 %vm2793_vm1, %v2792_v4 }
 0xc70   :  { %2656 = vmatprep.subr.mxu0 %v2792_v4 }
 0xc72   :  { %2649 = vmatmul.mubr.msk.f32.vlgmr.msra.gmra.mxu0 %vm120_vm2, %v3018_v54 }
 0xc73   :  { %2658 = vmatprep.mubr.msk.f32.mxu0 %vm2793_vm1, %v2792_v4 }
 0xd2e   :  { %v1293_v57 = vpop.f32.mrf.mxu1 }
 0xd2f   :  { %v1374_v58 = vsel %vm120_vm2, %v1293_v57, -inf }
 0xd30   :  { %1375 = vmax.xlane.f32.xlu0 %v1374_v58  ;;  %v2645_v59 = vpop.f32.mrf.mxu1  ;;  %v2458_v58 = vld [vmem:[%s3180_s2 + $0x38] sm:$0xff] }
 0xd32   :  { %v1370_v60 = vpop.f32.mrf.mxu0 }
 0xd33   :  { %v1377_v61 = vsel %vm120_vm2, %v1370_v60, -inf }
 0xd34   :  { %1378 = vmax.xlane.f32.xlu1 %v1377_v61  ;;  %v2650_v62 = vpop.f32.mrf.mxu0 }
 0xd45   :  { %1396 = vrot.lane.b32.xlu1 %v3014_v53, %s2795_s28 }
 0xd49   :  { %1550 = vrot.lane.b32.xlu1 %v3014_v53, %s2796_s29 }
 0xd4d   :  { %1628 = vrot.lane.b32.xlu1 %v3018_v54, %s2796_s29 }
 0xd51   :  { %1626 = vrot.lane.b32.xlu1 %v3018_v54, %s2797_s30 }
 0xdb9   :  { %v1376_v63 = vpop.xlane.xlu0 %1375 }
 0xdba   :  { %v1380_v0 = vsub.f32 %v1293_v57, %v1376_v63 }
 0xdbc   :  { %v1382_v9 = vmul.f32 1.442695, %v1380_v0 }
 0xdbd   :  { %v1379_v1 = vpop.xlane.xlu1 %1378 }
 0xdbe   :  { %v1381_v5 = vsub.f32 %v1370_v60, %v1379_v1 }
 0xdc0   :  { %v1384_v10 = vmul.f32 1.442695, %v1381_v5 }
 0xdc1   :  { %v1397_v11 = vpop.permute.xlu1 %1396 }
 0xdc2   :  { %2760 = vpow2.f32 %v1384_v10  ;;  %2652 = vmatpush3.msra.mxu1 %v1397_v11 }
 0xdc3   :  { %2661 = vmatprep.subr.mxu1 %v2792_v4  ;;  %2762 = vpow2.f32 %v1382_v9  ;;  %v1891_v9 = vrot.slane %v3010_v49, %v2945_v24 }
 0xdc5   :  { %v1551_v18 = vpop.permute.xlu1 %1550 }
 0xdc9   :  { %v1629_v21 = vpop.permute.xlu1 %1628 }
 0xdcd   :  { %v1627_v26 = vpop.permute.xlu1 %1626 }
 0xdcf   :  { %v2761_v13 = vpop.eup %2760 }
 0xdd0   :  { %v1389_v14 = vsel %vm120_vm2, %v2761_v13, 0.0  ;;  %v2763_v15 = vpop.eup %2762 }
 0xdd1   :  { %1390 = vadd.xlane.f32.xlu0 %v1389_v14  ;;  %v1386_v12 = vsel %vm120_vm2, %v2763_v15, 0.0 }
 0xdd5   :  { %1387 = vadd.xlane.f32.xlu0 %v1386_v12 }
 0xdeb   :  { %1472 = vrot.lane.b32.xlu0 %v3018_v54, %s2795_s28 }
 0xdef   :  { %1548 = vrot.lane.b32.xlu0 %v3014_v53, %s2797_s30 }
 0xe5a   :  { %v1391_v16 = vpop.xlane.xlu0 %1390 }
 0xe5b   :  { %2764 = vrcp.f32 %v1391_v16 }
 0xe5e   :  { %v1388_v17 = vpop.xlane.xlu0 %1387 }
 0xe5f   :  { %2766 = vrcp.f32 %v1388_v17 }
 0xe62   :  { %v1473_v19 = vpop.permute.xlu0 %1472 }
 0xe63   :  { %2657 = vmatpush3.msra.mxu0 %v1473_v19 }
 0xe64   :  { %2666 = vmatprep.subr.mxu0 %v2792_v4 }
 0xe66   :  { %v1549_v27 = vpop.permute.xlu0 %1548 }
 0xe68   :  { %v2765_v20 = vpop.eup %2764 }
 0xe69   :  { %v1395_v22 = vmul.f32 %v2765_v20, %v2761_v13 }
 0xe6b   :  { %2659 = vmatmul.mubr.msk.f32.vlgmr.msra.gmra.mxu0 %vm120_vm2, %v1395_v22 }
 0xe6c   :  { %v2767_v23 = vpop.eup %2766  ;;  %2667 = vmatpush3.xpose.msk.msra.mxu0 %vm120_vm2, %v1629_v21  ;;  %2668 = vmatprep.mubr.msk.f32.mxu0 %vm2793_vm1, %v2792_v4 }
 0xe6d   :  { %v1394_v25 = vmul.f32 %v2767_v23, %v2763_v15  ;;  %2676 = vmatprep.subr.mxu0 %v2792_v4 }
 0xe6f   :  { %2654 = vmatmul.mubr.msk.f32.vlgmr.msra.gmra.mxu1 %vm120_vm2, %v1394_v25  ;;  %2669 = vmatmul.mubr.msk.f32.vlgmr.msra.gmra.mxu0 %vm120_vm2, %v1627_v26 }
 0xe70   :  { %2662 = vmatpush3.xpose.msk.msra.mxu1 %vm120_vm2, %v1551_v18  ;;  %2663 = vmatprep.mubr.msk.f32.mxu1 %vm2793_vm1, %v2792_v4  ;;  %v2004_v18 = vrot.slane %v3010_v49, %v902_v34  ;;  %v2460_v34 = vld [vmem:[%s3180_s2 + $0x48] sm:$0xff] }
 0xe71   :  { %2671 = vmatprep.subr.mxu1 %v2792_v4  ;;  %2678 = vmatprep.mubr.msk.f32.mxu0 %vm2793_vm1, %v2792_v4 }
 0xe73   :  { %2664 = vmatmul.mubr.msk.f32.vlgmr.msra.gmra.mxu1 %vm120_vm2, %v1549_v27 }
 0xe74   :  { %2673 = vmatprep.mubr.msk.f32.mxu1 %vm2793_vm1, %v2792_v4 }
 0xf2b   :  { %v1544_v28 = vpop.f32.mrf.mxu0 }
 0xf2d   :  { %v2660_v29 = vpop.f32.mrf.mxu0 }
 0xf2f   :  { %v1468_v30 = vpop.f32.mrf.mxu1  ;;  %v1700_v31 = vpop.f32.mrf.mxu0 }
 0xf30   :  { %v1707_v33 = vsel %vm120_vm2, %v1700_v31, -inf }
 0xf31   :  { %v2655_v35 = vpop.f32.mrf.mxu1  ;;  %1708 = vmax.xlane.f32.xlu1 %v1707_v33  ;;  %v2670_v36 = vpop.f32.mrf.mxu0 }
 0xf33   :  { %v1622_v3 = vpop.f32.mrf.mxu1 }
 0xf34   :  { %v1704_v37 = vsel %vm120_vm2, %v1622_v3, -inf }
 0xf35   :  { %1705 = vmax.xlane.f32.xlu0 %v1704_v37  ;;  %v2665_v38 = vpop.f32.mrf.mxu1 }
 0xf42   :  { %1726 = vrot.lane.b32.xlu1 %v3014_v53, %s2798_s6 }
 0xfba   :  { %v1709_v8 = vpop.xlane.xlu1 %1708 }
 0xfbb   :  { %v1711_v39 = vsub.f32 %v1700_v31, %v1709_v8 }
 0xfbd   :  { %v1714_v4 = vmul.f32 1.442695, %v1711_v39 }
 0xfbe   :  { %v1706_v2 = vpop.xlane.xlu0 %1705  ;;  %v1727_v40 = vpop.permute.xlu1 %1726 }
 0xfbf   :  { %2768 = vpow2.f32 %v1714_v4  ;;  %v1710_v41 = vsub.f32 %v1622_v3, %v1706_v2  ;;  %2672 = vmatpush3.msra.mxu1 %v1727_v40 }
 0xfc0   :  { %2681 = vmatprep.subr.mxu1 %v2458_v58 }
 0xfc1   :  { %v1712_v42 = vmul.f32 1.442695, %v1710_v41 }
 0xfc3   :  { %2770 = vpow2.f32 %v1712_v42  ;;  %v2462_v42 = vld [vmem:[%s3180_s2 + $0x58] sm:$0xff] }
 0xfcc   :  { %v2769_v43 = vpop.eup %2768 }
 0xfcd   :  { %v1719_v44 = vsel %vm120_vm2, %v2769_v43, 0.0 }
 0xfce   :  { %1720 = vadd.xlane.f32.xlu0 %v1719_v44 }
 0xfd0   :  { %v2771_v45 = vpop.eup %2770 }
 0xfd1   :  { %v1716_v46 = vsel %vm120_vm2, %v2771_v45, 0.0 }
 0xfd2   :  { %1717 = vadd.xlane.f32.xlu0 %v1716_v46 }
 0xfe8   :  { %1802 = vrot.lane.b32.xlu0 %v3018_v54, %s2798_s6  ;;  %v2457_v54 = vld [vmem:[%s3180_s2 + $0x30] sm:$0xff] }
0x1057   :  { %v1721_v50 = vpop.xlane.xlu0 %1720 }
0x1058   :  { %2772 = vrcp.f32 %v1721_v50 }
0x105b   :  { %v1718_v51 = vpop.xlane.xlu0 %1717 }
0x105c   :  { %2774 = vrcp.f32 %v1718_v51 }
0x105f   :  { %v1803_v52 = vpop.permute.xlu0 %1802 }
0x1060   :  { %2677 = vmatpush3.msra.mxu0 %v1803_v52 }
0x1061   :  { %2688 = vmatprep.subr.mxu0 %v2460_v34 }
0x1065   :  { %v2773_v53 = vpop.eup %2772 }
0x1066   :  { %v1725_v55 = vmul.f32 %v2773_v53, %v2769_v43  ;;  %v2461_v43 = vld [vmem:[%s3180_s2 + $0x50] sm:$0xff] }
0x1068   :  { %2679 = vmatmul.mubr.msk.f32.vlgmr.msra.gmra.mxu0 %vm120_vm2, %v1725_v55 }
0x1069   :  { %v2775_v56 = vpop.eup %2774  ;;  %2689 = vmatpush3.msra.mxu0 %v2460_v34 }
0x106a   :  { %v1724_v57 = vmul.f32 %v2775_v56, %v2771_v45 }
0x106c   :  { %2674 = vmatmul.mubr.msk.f32.vlgmr.msra.gmra.mxu1 %vm120_vm2, %v1724_v57 }
0x106d   :  { %2682 = vmatpush3.msra.mxu1 %v2458_v58 }
0x106e   :  { %2683 = vmatprep.subr.mxu1 %v2457_v54 }
0x106f   :  { %2684 = vmatpush3.msra.mxu1 %v2457_v54 }
0x1070   :  { %2695 = vmatprep.subr.mxu1 %v2462_v42 }
0x1128   :  { %v1874_v59 = vpop.f32.mrf.mxu0 }
0x112a   :  { %v2680_v60 = vpop.f32.mrf.mxu0 }
0x112c   :  { %v1798_v61 = vpop.f32.mrf.mxu1 }
0x112d   :  { %1880 = vrot.lane.b32.xlu1 %v1798_v61, %s2799_s11 }
0x112e   :  { %v2675_v62 = vpop.f32.mrf.mxu1 }
0x1131   :  { %1882 = vrot.lane.b32.xlu1 %v1874_v59, %s2799_s11 }
0x119f   :  { %v1881_v63 = vpop.permute.xlu1 %1880 }
0x11a0   :  { %v1886_v0 = vsel %vm120_vm2, %v1468_v30, %v1881_v63 }
0x11a1   :  { %2685 = vmatprep.mubr.msk.f32.mxu1 %vm35_vm0, %v1886_v0 }
0x11a3   :  { %v1883_v1 = vpop.permute.xlu1 %1882 }
0x11a4   :  { %v1887_v5 = vsel %vm120_vm2, %v1544_v28, %v1883_v1  ;;  %v2459_v28 = vld [vmem:[%s3180_s2 + $0x40] sm:$0xff] }
0x11a5   :  { %2686 = vmatmul.mubr.msk.f32.vlgmr.msra.gmra.mxu1 %vm35_vm0, %v1887_v5  ;;  %2690 = vmatprep.subr.mxu0 %v2459_v28 }
0x11a6   :  { %2691 = vmatpush3.msra.mxu0 %v2459_v28  ;;  %2696 = vmatpush3.msra.mxu1 %v2462_v42 }
0x11a7   :  { %2697 = vmatprep.subr.mxu1 %v2461_v43 }
0x11a8   :  { %2698 = vmatpush3.msra.mxu1 %v2461_v43 }
0x11a9   :  { %2709 = vmatprep.subr.mxu1 %v2233_v6 }
0x1265   :  { %v2687_v10 = vpop.f32.mrf.mxu1 }
0x1266   :  { %v1970_v11 = vadd.f32 %v2687_v10, %v1891_v9 }
0x1267   :  { %v1964_v13 = vpop.f32.mrf.mxu1 }
0x1268   :  { %v1965_v14 = vadd.f32 %v1964_v13, %v1891_v9  ;;  %v1974_v15 = vadd.f32 %v1970_v11, %v2999_v48 }
0x126a   :  { %v1978_v12 = vsel %vm35_vm0, %v1974_v15, 0.0  ;;  %v1973_v16 = vadd.f32 %v1965_v14, %v2997_v47 }
0x126b   :  { %1979 = vadd.xlane.f32.xlu1 %v1978_v12  ;;  %v2215_v12 = vrot.slane %v3010_v49, %v1113_v32  ;;  %v2232_v32 = vld [vmem:[%s3181_s4 + $0x40] sm:$0xff]  ;;  %v2231_v49 = vld [vmem:[%s3181_s4 + $0x38] sm:$0xff] }
0x126c   :  { %v1975_v17 = vsel %vm35_vm0, %v1973_v16, 0.0 }
0x126d   :  { %1976 = vadd.xlane.f32.xlu0 %v1975_v17  ;;  %v2224_v17 = vld [vmem:[%s3181_s4] sm:$0xff] }
0x127c   :  { %2008 = vrot.lane.b32.xlu1 %v2004_v18, %s2794_s27 }
0x1280   :  { %2100 = vrot.lane.b32.xlu1 %v1891_v9, %s2795_s28 }
0x12f4   :  { %v1980_v19 = vpop.xlane.xlu1 %1979 }
0x12f5   :  { %v1982_v20 = vmul.f32 0.0625, %v1980_v19  ;;  %v2229_v19 = vld [vmem:[%s3181_s4 + $0x28] sm:$0xff] }
0x12f6   :  { %v1977_v21 = vpop.xlane.xlu0 %1976 }
0x12f7   :  { %v1981_v48 = vmul.f32 0.0625, %v1977_v21  ;;  %v1984_v22 = vsub.f32 %v1974_v15, %v1982_v20 }
0x12f8   :  { %v2009_v38 = vpop.permute.xlu1 %2008 }
0x12f9   :  { %v1983_v23 = vsub.f32 %v1973_v16, %v1981_v48  ;;  %v1986_v26 = vmul.f32 %v1984_v22, %v1984_v22  ;;  %v2225_v16 = vld [vmem:[%s3181_s4 + $0x8] sm:$0xff] }
0x12fa   :  { %2702 = vmatprep.subr.mxu0 %v2225_v16 }
0x12fb   :  { %v1985_v25 = vmul.f32 %v1983_v23, %v1983_v23  ;;  %v1990_v27 = vsel %vm35_vm0, %v1986_v26, 0.0 }
0x12fc   :  { %v2101_v55 = vpop.permute.xlu1 %2100 }
0x12fd   :  { %v1987_v47 = vsel %vm35_vm0, %v1985_v25, 0.0 }
0x12fe   :  { %1988 = vadd.xlane.f32.xlu0 %v1987_v47 }
0x1302   :  { %1991 = vadd.xlane.f32.xlu0 %v1990_v27 }
0x1318   :  { %2014 = vrot.lane.b32.xlu0 %v1891_v9, %s2794_s27 }
0x1387   :  { %v1989_v29 = vpop.xlane.xlu0 %1988 }
0x1388   :  { %v1993_v30 = vmul.f32 0.0625, %v1989_v29 }
0x138a   :  { %v1995_v31 = vadd.f32 1e-05, %v1993_v30 }
0x138b   :  { %v1992_v33 = vpop.xlane.xlu0 %1991 }
0x138c   :  { %2776 = vrsqrt.f32 %v1995_v31  ;;  %v1994_v35 = vmul.f32 0.0625, %v1992_v33 }
0x138e   :  { %v1996_v36 = vadd.f32 1e-05, %v1994_v35  ;;  %v2228_v35 = vld [vmem:[%s3181_s4 + $0x20] sm:$0xff] }
0x138f   :  { %v2015_v44 = vpop.permute.xlu0 %2014 }
0x1390   :  { %2778 = vrsqrt.f32 %v1996_v36  ;;  %v2227_v36 = vld [vmem:[%s3181_s4 + $0x18] sm:$0xff] }
0x1399   :  { %v2777_v3 = vpop.eup %2776 }
0x139a   :  { %v1999_v37 = vmul.f32 %v2777_v3, %v1983_v23  ;;  %v2226_v3 = vld [vmem:[%s3181_s4 + $0x10] sm:$0xff] }
0x139c   :  { %v2005_v8 = vmul.f32 %v2004_v18, %v1999_v37  ;;  %v2234_v37 = vld [vmem:[%s3181_s4 + $0x50] sm:$0xff] }
0x139d   :  { %v2779_v39 = vpop.eup %2778 }
0x139e   :  { %v2000_v4 = vmul.f32 %v2779_v39, %v1984_v22  ;;  %v2011_v2 = vadd.f32 %v2009_v38, %v2005_v8 }
0x13a0   :  { %v2006_v40 = vmul.f32 %v2004_v18, %v2000_v4  ;;  %2692 = vmatprep.mubr.msk.f32.mxu0 %vm35_vm0, %v2011_v2  ;;  %v2230_v18 = vld [vmem:[%s3181_s4 + $0x30] sm:$0xff] }
0x13a2   :  { %v2012_v41 = vadd.f32 %v2009_v38, %v2006_v40  ;;  %v2238_v38 = vrot.slane %v2234_v37, %v2859_v7 }
0x13a4   :  { %2693 = vmatmul.mubr.msk.f32.vlgmr.msra.gmra.mxu0 %vm35_vm0, %v2012_v41 }
0x13a5   :  { %2703 = vmatpush3.msra.mxu0 %v2225_v16 }
0x13a6   :  { %2704 = vmatprep.subr.mxu0 %v2224_v17 }
0x13a7   :  { %2705 = vmatpush3.msra.mxu0 %v2224_v17 }
0x1464   :  { %v2694_v45 = vpop.f32.mrf.mxu0 }
0x1465   :  { %v2095_v46 = vadd.f32 %v2694_v45, %v2015_v44 }
0x1466   :  { %v2089_v50 = vpop.f32.mrf.mxu0 }
0x1467   :  { %v2090_v51 = vadd.f32 %v2089_v50, %v2015_v44  ;;  %v2099_v53 = vmax.f32 %v2095_v46, 0.0 }
0x1469   :  { %v2098_v52 = vmax.f32 %v2090_v51, 0.0 }
0x146b   :  { %2699 = vmatprep.mubr.msk.f32.mxu1 %vm35_vm0, %v2098_v52 }
0x146c   :  { %2700 = vmatmul.mubr.msk.f32.vlgmr.msra.gmra.mxu1 %vm35_vm0, %v2099_v53 }
0x146d   :  { %2710 = vmatpush3.msra.mxu1 %v2233_v6 }
0x146e   :  { %2711 = vmatprep.subr.mxu1 %v2232_v32 }
0x146f   :  { %2712 = vmatpush3.msra.mxu1 %v2232_v32 }
0x1470   :  { %2713 = vmatprep.subr.mxu1 %v2231_v49 }
0x1471   :  { %2714 = vmatpush3.msra.mxu1 %v2231_v49 }
0x1472   :  { %2715 = vmatprep.subr.mxu1 %v2230_v18 }
0x1473   :  { %2716 = vmatpush3.msra.mxu1 %v2230_v18 }
0x1474   :  { %2717 = vmatprep.subr.mxu1 %v2229_v19 }
0x1475   :  { %2718 = vmatpush3.msra.mxu1 %v2229_v19 }
0x1476   :  { %2719 = vmatprep.subr.mxu1 %v2228_v35 }
0x1477   :  { %2720 = vmatpush3.msra.mxu1 %v2228_v35 }
0x1478   :  { %2721 = vmatprep.subr.mxu1 %v2227_v36 }
0x1479   :  { %2722 = vmatpush3.msra.mxu1 %v2227_v36 }
0x147a   :  { %2723 = vmatprep.subr.mxu1 %v2226_v3 }
0x147b   :  { %2724 = vmatpush3.msra.mxu1 %v2226_v3 }
0x152c   :  { %v2701_v56 = vpop.f32.mrf.mxu1 }
0x152d   :  { %v2181_v57 = vadd.f32 %v2701_v56, %v2101_v55 }
0x152e   :  { %v2175_v58 = vpop.f32.mrf.mxu1 }
0x152f   :  { %v2176_v54 = vadd.f32 %v2175_v58, %v2101_v55  ;;  %v2185_v59 = vadd.f32 %v2181_v57, %v2012_v41  ;;  %v2323_v41 = vrot.slane %v2234_v37, %v2945_v24 }
0x1531   :  { %v2189_v60 = vsel %vm35_vm0, %v2185_v59, 0.0  ;;  %v2184_v61 = vadd.f32 %v2176_v54, %v2011_v2 }
0x1532   :  { %2190 = vadd.xlane.f32.xlu0 %v2189_v60 }
0x1533   :  { %v2186_v62 = vsel %vm35_vm0, %v2184_v61, 0.0 }
0x1534   :  { %2187 = vadd.xlane.f32.xlu1 %v2186_v62 }
0x15bb   :  { %v2191_v63 = vpop.xlane.xlu0 %2190 }
0x15bc   :  { %v2193_v0 = vmul.f32 0.0625, %v2191_v63 }
0x15bd   :  { %v2188_v1 = vpop.xlane.xlu1 %2187 }
0x15be   :  { %v2195_v5 = vsub.f32 %v2185_v59, %v2193_v0  ;;  %v2192_v9 = vmul.f32 0.0625, %v2188_v1 }
0x15c0   :  { %v2194_v10 = vsub.f32 %v2184_v61, %v2192_v9  ;;  %v2197_v11 = vmul.f32 %v2195_v5, %v2195_v5 }
0x15c2   :  { %v2201_v13 = vsel %vm35_vm0, %v2197_v11, 0.0  ;;  %v2196_v14 = vmul.f32 %v2194_v10, %v2194_v10 }
0x15c3   :  { %2202 = vadd.xlane.f32.xlu1 %v2201_v13 }
0x15c4   :  { %v2198_v15 = vsel %vm35_vm0, %v2196_v14, 0.0 }
0x15c5   :  { %2199 = vadd.xlane.f32.xlu0 %v2198_v15 }
0x15db   :  { %2219 = vrot.lane.b32.xlu0 %v2215_v12, %s2794_s27 }
0x164c   :  { %v2203_v20 = vpop.xlane.xlu1 %2202 }
0x164d   :  { %v2205_v21 = vmul.f32 0.0625, %v2203_v20 }
0x164e   :  { %v2200_v48 = vpop.xlane.xlu0 %2199 }
0x164f   :  { %v2207_v22 = vadd.f32 1e-05, %v2205_v21  ;;  %v2204_v23 = vmul.f32 0.0625, %v2200_v48 }
0x1651   :  { %2780 = vrsqrt.f32 %v2207_v22  ;;  %v2206_v25 = vadd.f32 1e-05, %v2204_v23 }
0x1652   :  { %v2220_v30 = vpop.permute.xlu0 %2219 }
0x1653   :  { %2782 = vrsqrt.f32 %v2206_v25 }
0x165e   :  { %v2781_v47 = vpop.eup %2780 }
0x165f   :  { %v2211_v26 = vmul.f32 %v2781_v47, %v2195_v5 }
0x1660   :  { %v2783_v27 = vpop.eup %2782 }
0x1661   :  { %v2210_v34 = vmul.f32 %v2783_v27, %v2194_v10  ;;  %v2217_v28 = vmul.f32 %v2215_v12, %v2211_v26 }
0x1663   :  { %v2216_v29 = vmul.f32 %v2215_v12, %v2210_v34  ;;  %v2223_v33 = vadd.f32 %v2220_v30, %v2217_v28 }
0x1665   :  { %v2222_v31 = vadd.f32 %v2220_v30, %v2216_v29 }
0x1667   :  { %2706 = vmatprep.mubr.msk.f32.mxu0 %vm35_vm0, %v2222_v31 }
0x1668   :  { %2707 = vmatmul.mubr.msk.f32.vlgmr.msra.gmra.mxu0 %vm35_vm0, %v2223_v33 }
0x1728   :  { %v2708_v8 = vpop.f32.mrf.mxu0 }
0x1729   :  { %v2317_v2 = vadd.f32 %v2708_v8, %v2238_v38 }
0x172a   :  { %v2311_v39 = vpop.f32.mrf.mxu0 }
0x172b   :  { %v2312_v4 = vadd.f32 %v2311_v39, %v2238_v38 }
0x172d   :  { %2725 = vmatprep.mubr.msk.f32.mxu1 %vm2324_vm3, %v2312_v4 }
0x172e   :  { %2726 = vmatmul.mubr.msk.f32.vlgmr.msra.gmra.mxu1 %vm2324_vm3, %v2317_v2 }
0x17ee   :  { %v2727_v40 = vpop.f32.mrf.mxu1 }
0x17ef   :  { %v2403_v44 = vadd.f32 %v2727_v40, %v2323_v41 }
0x17f0   :  { %v2397_v42 = vpop.f32.mrf.mxu1 }
0x17f1   :  { %v2398_v43 = vadd.f32 %v2397_v42, %v2323_v41  ;;  %v2410_v46 = vsel %vm2406_vm4, %v2403_v44, -inf }
0x17f3   :  { %v2407_v45 = vsel %vm2406_vm4, %v2398_v43, -inf }
0x17f4   :  { %2408 = vmax.xlane.f32.xlu1 %v2407_v45 }
0x17f8   :  { %2411 = vmax.xlane.f32.xlu1 %v2410_v46 }
0x187d   :  { %v2409_v7 = vpop.xlane.xlu1 %2408 }
0x187e   :  { %v2413_v50 = vsub.f32 %v2398_v43, %v2409_v7 }
0x1880   :  { %v2415_v51 = vmul.f32 1.442695, %v2413_v50 }
0x1881   :  { %v2412_v52 = vpop.xlane.xlu1 %2411 }
0x1882   :  { %2784 = vpow2.f32 %v2415_v51  ;;  %v2414_v53 = vsub.f32 %v2403_v44, %v2412_v52 }
0x1884   :  { %v2417_v55 = vmul.f32 1.442695, %v2414_v53 }
0x1886   :  { %2786 = vpow2.f32 %v2417_v55 }
0x188f   :  { %v2785_v56 = vpop.eup %2784 }
0x1890   :  { %v2419_v24 = vsel %vm2406_vm4, %v2785_v56, 0.0 }
0x1891   :  { %2420 = vadd.xlane.f32.xlu1 %v2419_v24 }
0x1893   :  { %v2787_v57 = vpop.eup %2786 }
0x1894   :  { %v2422_v58 = vsel %vm2406_vm4, %v2787_v57, 0.0 }
0x1895   :  { %2423 = vadd.xlane.f32.xlu1 %v2422_v58 }
0x191a   :  { %v2421_v54 = vpop.xlane.xlu1 %2420 }
0x191b   :  { %2788 = vrcp.f32 %v2421_v54 }
0x191e   :  { %v2424_v59 = vpop.xlane.xlu1 %2423 }
0x191f   :  { %2790 = vrcp.f32 %v2424_v59 }
0x1928   :  { %v2789_v60 = vpop.eup %2788 }
0x1929   :  { %v2426_v61 = vmul.f32 %v2789_v60, %v2785_v56 }
0x192b   :  { %2429 = vst.msk [vmem:[%s3182_s5] sm:$0xff] %vm2406_vm4, %v2426_v61 }
0x192c   :  { %v2791_v62 = vpop.eup %2790 }
0x192d   :  { %v2428_v63 = vmul.f32 %v2791_v62, %v2787_v57 }
0x192f   :  { %2430 = vst.msk [vmem:[%s3182_s5 + $0x8] sm:$0xff] %vm2406_vm4, %v2428_v63 }

</bundles_post_ra>
